<compile_context>
chip_gen: v7x
topology: tpu7x:2x2x1
jax: 0.10.0
libtpu: 0.0.40
codegen_flags: <defaults>
</compile_context>

<pallas_src>
import functools

import jax
import jax.numpy as jnp
from jax.experimental import pallas as pl
from jax.experimental.pallas import tpu as pltpu

LANE = 128
VMEM_LIMIT_BYTES = 48 * 1024 * 1024       # fits v7x 64 MiB/TC; generous for v5e/v6e
RESIDENT_XL_BYTES = 8 * 1024 * 1024       # keep the resident feature slab (x2 buffers) small


def _round_up(n, m):
    return ((n + m - 1) // m) * m


def _pad2d(a, rows, cols):
    return jnp.pad(a, ((0, rows - a.shape[0]), (0, cols - a.shape[1])))


def _masked_log_softmax(logits, c_out):
    """log_softmax over the first c_out lanes; pad lanes masked to -inf (sliced off later)."""
    col = jax.lax.broadcasted_iota(jnp.int32, logits.shape, 1)
    logits = jnp.where(col < c_out, logits, -jnp.inf)
    m = jnp.max(logits, axis=-1, keepdims=True)
    s = logits - m
    lse = jnp.log(jnp.sum(jnp.exp(s), axis=-1, keepdims=True))
    return s - lse


# ---------------------------------------------------------------------------
# Fast path: one fully fused kernel (small N), all f32 math.
# ---------------------------------------------------------------------------
def _sage_fused_kernel(adj_ref, invdeg_ref, x_ref, wl1_ref, wr1_ref, b1_ref,
                       wl2_ref, wr2_ref, b2_ref, o_ref, *, c_out):
    adj = adj_ref[...].astype(jnp.float32)          # int8 counts -> f32 (exact)
    inv_deg = invdeg_ref[...]                       # (N, 1) f32
    x = x_ref[...]                                  # (N, Cin_pad) f32

    # Layer 1: mean aggregation + lin_l / lin_r (no concatenate: two dots summed).
    agg1 = jnp.dot(adj, x, preferred_element_type=jnp.float32) * inv_deg
    h = (jnp.dot(agg1, wl1_ref[...], preferred_element_type=jnp.float32)
         + jnp.dot(x, wr1_ref[...], preferred_element_type=jnp.float32)
         + b1_ref[...])
    h = jnp.maximum(h, 0.0)

    # Layer 2.
    agg2 = jnp.dot(adj, h, preferred_element_type=jnp.float32) * inv_deg
    out = (jnp.dot(agg2, wl2_ref[...], preferred_element_type=jnp.float32)
           + jnp.dot(h, wr2_ref[...], preferred_element_type=jnp.float32)
           + b2_ref[...])

    o_ref[...] = _masked_log_softmax(out, c_out)


# ---------------------------------------------------------------------------
# Tiled path: one pipelined kernel per SAGE layer.
#   grid = (row tiles [parallel], adjacency-column reduction tiles [arbitrary]).
#   inputs: int8 adj counts, bf16 projected neighbor features xl = x@wl,
#           f32 self path xr = x@wr + b, f32 1/deg.
# ---------------------------------------------------------------------------
def _sage_layer_kernel(adj_ref, xl_ref, xr_ref, invdeg_ref, o_ref, acc_ref,
                       *, activation, c_out, tk, resident_xl):
    k = pl.program_id(1)

    @pl.when(k == 0)
    def _():
        acc_ref[...] = jnp.zeros_like(acc_ref)

    adj = adj_ref[...].astype(jnp.bfloat16)         # int8 counts -> bf16 (exact, VPU has slack)
    if resident_xl:
        start = pl.multiple_of(k * tk, LANE)
        xl = xl_ref[pl.ds(start, tk), :]            # slice the resident feature slab
    else:
        xl = xl_ref[...]
    acc_ref[...] += jnp.dot(adj, xl, preferred_element_type=jnp.float32)

    @pl.when(k == pl.num_programs(1) - 1)
    def _():
        out = acc_ref[...] * invdeg_ref[...] + xr_ref[...]
        if activation == "relu":
            o_ref[...] = jnp.maximum(out, 0.0)
        else:  # "log_softmax"
            o_ref[...] = _masked_log_softmax(out, c_out)


def _sage_layer_tiled(adj_i8, xl_bf16, xr_f32, inv_deg, *, activation, c_out, tm, tk):
    n_pad_r, n_pad_c = adj_i8.shape
    c = xl_bf16.shape[1]
    grid = (n_pad_r // tm, n_pad_c // tk)

    resident = (n_pad_c * c * xl_bf16.dtype.itemsize) <= RESIDENT_XL_BYTES
    if resident:
        # Whole projected feature matrix stays resident in VMEM; no per-row-tile re-DMA.
        xl_spec = pl.BlockSpec((n_pad_c, c), lambda i, k: (0, 0))
    else:
        # Streamed along the reduction axis.
        # TODO(synk): consider pipeline_mode=pl.Buffered(3) on the adj stream here.
        xl_spec = pl.BlockSpec((tk, c), lambda i, k: (k, 0))

    kernel = functools.partial(_sage_layer_kernel, activation=activation,
                               c_out=c_out, tk=tk, resident_xl=resident)
    return pl.pallas_call(
        kernel,
        out_shape=jax.ShapeDtypeStruct((n_pad_r, c), jnp.float32),
        grid_spec=pltpu.PrefetchScalarGridSpec(
            num_scalar_prefetch=0,
            grid=grid,
            in_specs=[
                pl.BlockSpec((tm, tk), lambda i, k: (i, k)),   # int8 adjacency counts
                xl_spec,                                        # bf16 x @ wl
                pl.BlockSpec((tm, c), lambda i, k: (i, 0)),     # f32 x @ wr + b (row tile)
                pl.BlockSpec((tm, 1), lambda i, k: (i, 0)),     # f32 1/deg (row tile)
            ],
            out_specs=pl.BlockSpec((tm, c), lambda i, k: (i, 0)),
            scratch_shapes=[pltpu.VMEM((tm, c), jnp.float32)],  # aggregation accumulator
        ),
        compiler_params=pltpu.CompilerParams(
            dimension_semantics=("parallel", "arbitrary"),
            vmem_limit_bytes=VMEM_LIMIT_BYTES,
        ),
    )(adj_i8, xl_bf16, xr_f32, inv_deg)


# ---------------------------------------------------------------------------
# Glue: adjacency build (once), parameter padding, dispatch.
# ---------------------------------------------------------------------------
def build_graph(edge_index, num_nodes):
    """Dense int8 edge-count adjacency + f32 per-row 1/deg.  Build once, reuse."""
    src, dst = edge_index[0], edge_index[1]
    counts = jnp.zeros((num_nodes, num_nodes), jnp.float32).at[dst, src].add(1.0)
    counts = jnp.minimum(counts, 127.0)     # int8 range (parallel-edge counts clipped)
    deg = jnp.sum(counts, axis=1, keepdims=True)
    inv_deg = jnp.where(deg > 0.0, 1.0 / jnp.maximum(deg, 1.0), 0.0)  # isolated nodes -> 0
    return counts.astype(jnp.int8), inv_deg.astype(jnp.float32)


def _pad_params(params, c_in_pad, hidden_pad, c_out_pad):
    f32 = jnp.float32
    return dict(
        wl1=_pad2d(params["wl1"].astype(f32), c_in_pad, hidden_pad),
        wr1=_pad2d(params["wr1"].astype(f32), c_in_pad, hidden_pad),
        b1=_pad2d(params["b1"].reshape(1, -1).astype(f32), 1, hidden_pad),
        wl2=_pad2d(params["wl2"].astype(f32), hidden_pad, c_out_pad),
        wr2=_pad2d(params["wr2"].astype(f32), hidden_pad, c_out_pad),
        b2=_pad2d(params["b2"].reshape(1, -1).astype(f32), 1, c_out_pad),
    )


def graphsage_forward(x, adj_i8, inv_deg, params, *, fast_path_max_nodes=1024):
    """x: (N, C_in) f32; adj_i8/inv_deg from build_graph (built once, reused)."""
    n = x.shape[0]
    c_in = params["wl1"].shape[0]
    hidden = params["wl1"].shape[1]
    c_out = params["wl2"].shape[1]

    c_in_pad = _round_up(c_in, LANE)
    hidden_pad = _round_up(hidden, LANE)
    c_out_pad = _round_up(c_out, LANE)
    p = _pad_params(params, c_in_pad, hidden_pad, c_out_pad)

    if n <= fast_path_max_nodes:
        # Everything fits in VMEM: single fused kernel, full-array blocks.
        n8 = _round_up(n, 8)
        adj_p = _pad2d(adj_i8, n8, n8)
        invdeg_p = _pad2d(inv_deg, n8, 1)
        x_p = _pad2d(x.astype(jnp.float32), n8, c_in_pad)
        full = lambda a: pl.BlockSpec(a.shape, lambda: (0,) * a.ndim)
        out = pl.pallas_call(
            functools.partial(_sage_fused_kernel, c_out=c_out),
            out_shape=jax.ShapeDtypeStruct((n8, c_out_pad), jnp.float32),
            in_specs=[full(adj_p), full(invdeg_p), full(x_p),
                      full(p["wl1"]), full(p["wr1"]), full(p["b1"]),
                      full(p["wl2"]), full(p["wr2"]), full(p["b2"])],
            out_specs=pl.BlockSpec((n8, c_out_pad), lambda: (0, 0)),
            compiler_params=pltpu.CompilerParams(vmem_limit_bytes=VMEM_LIMIT_BYTES),
        )(adj_p, invdeg_p, x_p, p["wl1"], p["wr1"], p["b1"],
          p["wl2"], p["wr2"], p["b2"])
        return out[:n, :c_out]

    # ---- Tiled / pipelined path --------------------------------------------------------
    # Rectangular adjacency tiles: rows padded to tm, columns padded (independently) to tk.
    tm = 256
    n_pad_r = _round_up(n, tm)
    base = _round_up(n, 256)
    if base <= 2048:
        tk = base                                   # single reduction step when it fits
    else:
        tk = min((2048, 1792, 1536, 1280, 1024),    # big tk, minimal column padding
                 key=lambda t: (_round_up(n, t), -t))
    n_pad_c = _round_up(n, tk)                      # >= n_pad_r (tk is a multiple of 256)

    adj_p = _pad2d(adj_i8, n_pad_r, n_pad_c)        # extra rows/cols are zero -> no effect
    invdeg_p = _pad2d(inv_deg, n_pad_r, 1)
    x_p = _pad2d(x.astype(jnp.float32), n_pad_c, c_in_pad)

    # Hoisted projections: (adj @ x) @ W == adj @ (x @ W).  These are tiny O(N*C*H) XLA
    # matmuls; the Pallas kernels then only stream the O(N^2) adjacency + 128-lane slabs.
    xl1 = (x_p @ p["wl1"]).astype(jnp.bfloat16)                 # (n_pad_c, hidden_pad)
    xr1 = x_p[:n_pad_r] @ p["wr1"] + p["b1"]                    # (n_pad_r, hidden_pad) f32
    h = _sage_layer_tiled(adj_p, xl1, xr1, invdeg_p,
                          activation="relu", c_out=hidden, tm=tm, tk=tk)

    h_c = _pad2d(h, n_pad_c, hidden_pad)                        # zero rows for padded columns
    xl2 = (h_c @ p["wl2"]).astype(jnp.bfloat16)                 # (n_pad_c, c_out_pad)
    xr2 = h @ p["wr2"] + p["b2"]                                # (n_pad_r, c_out_pad) f32
    out = _sage_layer_tiled(adj_p, xl2, xr2, invdeg_p,
                            activation="log_softmax", c_out=c_out, tm=tm, tk=tk)
    return out[:n, :c_out]


def graphsage_reference(x, adj_i8, inv_deg, params):
    """Pure-JAX f32 reference (exact mean via 1/deg, same int8-count adjacency)."""
    adj = adj_i8.astype(jnp.float32)
    agg1 = (adj @ x) * inv_deg
    h = jnp.maximum(agg1 @ params["wl1"] + x @ params["wr1"] + params["b1"], 0.0)
    agg2 = (adj @ h) * inv_deg
    out = agg2 @ params["wl2"] + h @ params["wr2"] + params["b2"]
    return jax.nn.log_softmax(out, axis=1)


def init_params(key, in_channels, hidden_channels, out_channels):
    ks = jax.random.split(key, 6)

    def lin(k, fan_in, fan_out):
        bound = 1.0 / jnp.sqrt(fan_in)
        return jax.random.uniform(k, (fan_in, fan_out), jnp.float32, -bound, bound)

    return {
        "wl1": lin(ks[0], in_channels, hidden_channels),
        "wr1": lin(ks[1], in_channels, hidden_channels),
        "b1": jnp.zeros((1, hidden_channels), jnp.float32),
        "wl2": lin(ks[2], hidden_channels, out_channels),
        "wr2": lin(ks[3], hidden_channels, out_channels),
        "b2": jnp.zeros((1, out_channels), jnp.float32),
    }


if __name__ == "__main__":
    key = jax.random.PRNGKey(0)
    k_x, k_e, k_p = jax.random.split(key, 3)

    n_nodes, n_edges = 128, 512
    in_channels, hidden_channels, out_channels = 16, 32, 8

    x = jax.random.normal(k_x, (n_nodes, in_channels), jnp.float32)
    edge_index = jax.random.randint(k_e, (2, n_edges), 0, n_nodes, jnp.int32)
    params = init_params(k_p, in_channels, hidden_channels, out_channels)

    adj_i8, inv_deg = build_graph(edge_index, n_nodes)   # built once, reused across calls

    # Fast path (single fused kernel) at the example size.
    out_fast = graphsage_forward(x, adj_i8, inv_deg, params)
    jax.block_until_ready(out_fast)

    # Tiled / pipelined grid path (forced) to exercise the large-N code path.
    out_tiled = graphsage_forward(x, adj_i8, inv_deg, params, fast_path_max_nodes=0)
    jax.block_until_ready(out_tiled)

    ref = graphsage_reference(x, adj_i8, inv_deg, params)

    assert out_fast.shape == (n_nodes, out_channels)
    assert out_tiled.shape == (n_nodes, out_channels)
    # log_softmax rows must sum (in prob space) to ~1
    assert bool(jnp.allclose(jnp.sum(jnp.exp(out_fast), axis=1), 1.0, atol=1e-3))
    assert bool(jnp.allclose(out_fast, ref, atol=1e-2, rtol=1e-2))
    assert bool(jnp.allclose(out_tiled, ref, atol=5e-2, rtol=5e-2))
    print("KERNEL_OK")
</pallas_src>

<mosaic_0001>
module attributes {stable_mosaic.version = 11 : i64} {
  func.func @_sage_fused_kernel(%arg0: memref<128x128xi8, #tpu.memory_space<vmem>>, %arg1: memref<128x1xf32, #tpu.memory_space<vmem>>, %arg2: memref<128x128xf32, #tpu.memory_space<vmem>>, %arg3: memref<128x128xf32, #tpu.memory_space<vmem>>, %arg4: memref<128x128xf32, #tpu.memory_space<vmem>>, %arg5: memref<1x128xf32, #tpu.memory_space<vmem>>, %arg6: memref<128x128xf32, #tpu.memory_space<vmem>>, %arg7: memref<128x128xf32, #tpu.memory_space<vmem>>, %arg8: memref<1x128xf32, #tpu.memory_space<vmem>>, %arg9: memref<128x128xf32, #tpu.memory_space<vmem>>) attributes {dimension_semantics = [], scalar_prefetch = 0 : i64, scratch_operands = 0 : i64, tpu.core_type = #tpu.core_type<tc>} {
    %c0 = arith.constant 0 : index
    %c0_0 = arith.constant 0 : index
    %0 = vector.load %arg0[%c0, %c0_0] : memref<128x128xi8, #tpu.memory_space<vmem>>, vector<128x128xi8>
    %1 = arith.sitofp %0 : vector<128x128xi8> to vector<128x128xf32>
    %c0_1 = arith.constant 0 : index
    %c0_2 = arith.constant 0 : index
    %2 = vector.load %arg1[%c0_1, %c0_2] : memref<128x1xf32, #tpu.memory_space<vmem>>, vector<128x1xf32>
    %c0_3 = arith.constant 0 : index
    %c0_4 = arith.constant 0 : index
    %3 = vector.load %arg2[%c0_3, %c0_4] : memref<128x128xf32, #tpu.memory_space<vmem>>, vector<128x128xf32>
    %cst = arith.constant dense<0.000000e+00> : vector<128x128xf32>
    %4 = tpu.matmul %1, %3, %cst {dimension_numbers = #tpu.dot_dimension_numbers<[1], [0], [0], [1], [0, 0, 1, 1], [], []>} : vector<128x128xf32>, vector<128x128xf32>, vector<128x128xf32> -> vector<128x128xf32>
    %5 = vector.broadcast %2 : vector<128x1xf32> to vector<128x128xf32>
    %6 = arith.mulf %4, %5 : vector<128x128xf32>
    %c0_5 = arith.constant 0 : index
    %c0_6 = arith.constant 0 : index
    %7 = vector.load %arg3[%c0_5, %c0_6] : memref<128x128xf32, #tpu.memory_space<vmem>>, vector<128x128xf32>
    %cst_7 = arith.constant dense<0.000000e+00> : vector<128x128xf32>
    %8 = tpu.matmul %6, %7, %cst_7 {dimension_numbers = #tpu.dot_dimension_numbers<[1], [0], [0], [1], [0, 0, 1, 1], [], []>} : vector<128x128xf32>, vector<128x128xf32>, vector<128x128xf32> -> vector<128x128xf32>
    %c0_8 = arith.constant 0 : index
    %c0_9 = arith.constant 0 : index
    %9 = vector.load %arg4[%c0_8, %c0_9] : memref<128x128xf32, #tpu.memory_space<vmem>>, vector<128x128xf32>
    %cst_10 = arith.constant dense<0.000000e+00> : vector<128x128xf32>
    %10 = tpu.matmul %3, %9, %cst_10 {dimension_numbers = #tpu.dot_dimension_numbers<[1], [0], [0], [1], [0, 0, 1, 1], [], []>} : vector<128x128xf32>, vector<128x128xf32>, vector<128x128xf32> -> vector<128x128xf32>
    %11 = arith.addf %8, %10 : vector<128x128xf32>
    %c0_11 = arith.constant 0 : index
    %c0_12 = arith.constant 0 : index
    %12 = vector.load %arg5[%c0_11, %c0_12] : memref<1x128xf32, #tpu.memory_space<vmem>>, vector<1x128xf32>
    %13 = vector.broadcast %12 : vector<1x128xf32> to vector<128x128xf32>
    %14 = arith.addf %11, %13 : vector<128x128xf32>
    %cst_13 = arith.constant 0.000000e+00 : f32
    %15 = vector.broadcast %cst_13 : f32 to vector<128x128xf32>
    %16 = arith.maximumf %14, %15 : vector<128x128xf32>
    %cst_14 = arith.constant dense<0.000000e+00> : vector<128x128xf32>
    %17 = tpu.matmul %1, %16, %cst_14 {dimension_numbers = #tpu.dot_dimension_numbers<[1], [0], [0], [1], [0, 0, 1, 1], [], []>} : vector<128x128xf32>, vector<128x128xf32>, vector<128x128xf32> -> vector<128x128xf32>
    %18 = vector.broadcast %2 : vector<128x1xf32> to vector<128x128xf32>
    %19 = arith.mulf %17, %18 : vector<128x128xf32>
    %c0_15 = arith.constant 0 : index
    %c0_16 = arith.constant 0 : index
    %20 = vector.load %arg6[%c0_15, %c0_16] : memref<128x128xf32, #tpu.memory_space<vmem>>, vector<128x128xf32>
    %cst_17 = arith.constant dense<0.000000e+00> : vector<128x128xf32>
    %21 = tpu.matmul %19, %20, %cst_17 {dimension_numbers = #tpu.dot_dimension_numbers<[1], [0], [0], [1], [0, 0, 1, 1], [], []>} : vector<128x128xf32>, vector<128x128xf32>, vector<128x128xf32> -> vector<128x128xf32>
    %c0_18 = arith.constant 0 : index
    %c0_19 = arith.constant 0 : index
    %22 = vector.load %arg7[%c0_18, %c0_19] : memref<128x128xf32, #tpu.memory_space<vmem>>, vector<128x128xf32>
    %cst_20 = arith.constant dense<0.000000e+00> : vector<128x128xf32>
    %23 = tpu.matmul %16, %22, %cst_20 {dimension_numbers = #tpu.dot_dimension_numbers<[1], [0], [0], [1], [0, 0, 1, 1], [], []>} : vector<128x128xf32>, vector<128x128xf32>, vector<128x128xf32> -> vector<128x128xf32>
    %24 = arith.addf %21, %23 : vector<128x128xf32>
    %c0_21 = arith.constant 0 : index
    %c0_22 = arith.constant 0 : index
    %25 = vector.load %arg8[%c0_21, %c0_22] : memref<1x128xf32, #tpu.memory_space<vmem>>, vector<1x128xf32>
    %26 = vector.broadcast %25 : vector<1x128xf32> to vector<128x128xf32>
    %27 = arith.addf %24, %26 : vector<128x128xf32>
    %28 = tpu.iota {dimensions = array<i32: 1>} : vector<128x128xi32>
    %c8_i32 = arith.constant 8 : i32
    %29 = vector.broadcast %c8_i32 : i32 to vector<128x128xi32>
    %30 = arith.cmpi slt, %28, %29 : vector<128x128xi32>
    %cst_23 = arith.constant 0xFF800000 : f32
    %31 = vector.broadcast %cst_23 : f32 to vector<128x128xf32>
    %32 = arith.select %30, %27, %31 : vector<128x128xi1>, vector<128x128xf32>
    %cst_24 = arith.constant dense<0xFF800000> : vector<128xf32>
    %33 = vector.multi_reduction <maximumf>, %32, %cst_24 [1] : vector<128x128xf32> to vector<128xf32>
    %34 = vector.shape_cast %33 : vector<128xf32> to vector<128x1xf32>
    %35 = vector.broadcast %34 : vector<128x1xf32> to vector<128x128xf32>
    %36 = arith.subf %32, %35 : vector<128x128xf32>
    %37 = math.exp %36 : vector<128x128xf32>
    %cst_25 = arith.constant dense<0.000000e+00> : vector<128xf32>
    %38 = vector.multi_reduction <add>, %37, %cst_25 [1] : vector<128x128xf32> to vector<128xf32>
    %39 = vector.shape_cast %38 : vector<128xf32> to vector<128x1xf32>
    %40 = math.log %39 : vector<128x1xf32>
    %41 = vector.broadcast %40 : vector<128x1xf32> to vector<128x128xf32>
    %42 = arith.subf %36, %41 : vector<128x128xf32>
    %c0_26 = arith.constant 0 : index
    %c0_27 = arith.constant 0 : index
    %43 = vector.load %arg9[%c0_26, %c0_27] : memref<128x128xf32, #tpu.memory_space<vmem>>, vector<128x128xf32>
    tpu.vector_store %arg9[%c0_26, %c0_27], %42 {strides = array<i32>} : memref<128x128xf32, #tpu.memory_space<vmem>>, vector<128x128xf32>,
    return
  }
}

</mosaic_0001>

<bundles_post_ra>
// kernel: tpu_custom_call.1
= control target key start
LH: loop header
LB: loop body
LE: loop exit
PB: predicated region body
PF: predicated region fallthrough
CT: control target
= control target key end

     0   :  { %14 = vsyncpa [#allocation3], 0  ;;  %s3176_s0 = inlined_call_operand.hbm [shape: s8[128,128], index: 0, kind: input, shape index: {}]   ;;  %s3177_s1 = inlined_call_operand.vmem [shape: f32[128,1], index: 1, kind: input, shape index: {}]   ;;  %s3178_s2 = inlined_call_operand.vmem [shape: f32[128,128], index: 2, kind: input, shape index: {}]   ;;  %s3179_s3 = inlined_call_operand.hbm [shape: f32[128,128], index: 3, kind: input, shape index: {}]   ;;  %s3180_s4 = inlined_call_operand.hbm [shape: f32[128,128], index: 4, kind: input, shape index: {}]   ;;  %s3181_s5 = inlined_call_operand.vmem [shape: f32[1,128], index: 5, kind: input, shape index: {}]   ;;  %s3182_s6 = inlined_call_operand.hbm [shape: f32[128,128], index: 6, kind: input, shape index: {}]   ;;  %s3183_s7 = inlined_call_operand.hbm [shape: f32[128,128], index: 7, kind: input, shape index: {}]   ;;  %s3184_s8 = inlined_call_operand.vmem [shape: f32[1,128], index: 8, kind: input, shape index: {}]   ;;  %s3185_s9 = inlined_call_operand.hbm [shape: f32[128,128], index: 9, kind: output, shape index: {}]  }
   0x1   :  { %15 = vsyncpa [#allocation6], 0 }
   0x2   :  { %16 = vsyncpa [#allocation9], 0 }
   0x3   :  { %17 = vsyncpa [#allocation4], 0  ;;  %s2460_s30 = smov [#allocation5]   ;;  %s2461_s11 = smov [#allocation8]  }
   0x4   :  { %s39_s10 = sshll.u32 %s2460_s30, 4  ;;  %s65_s12 = sshll.u32 %s2461_s11, 4  ;;  %s40_s10 = int_to_ptr.vmem [resolvable:$true] %s39_s10  ;;  %s2519_s12 = int_to_ptr.vmem [resolvable:$true] %s65_s12 }
   0x5   :  { %s2320_s15 = scalar_lea.hbm %s3179_s3, 2048 }
   0x6   :  { %p2321_p0 = scmp.ne.s32.totalorder %s3179_s3, %s2320_s15  ;;  %p2324_p1 = scmp.lt.u32.totalorder %s2320_s15, %s3179_s3 }
   0x8   :  { %p2326_p2 = pnand %p2324_p1, %p2321_p0 }
   0xa   :  { %2329 = shalt.err (!%p2326_p2)
}
   0xb   :  { %s2330_s20 = scalar_lea.vmem %s40_s10, 2048  ;;  %p2335_p4 = scmp.lt.s32.totalorder %s40_s10, %s40_s10 }
   0xc   :  { %p2331_p3 = scmp.ne.s32.totalorder %s40_s10, %s2330_s20  ;;  %p2336_p5 = scmp.lt.s32.totalorder %s2330_s20, %s2330_s20 }
   0xe   :  { %p2337_p6 = por %p2336_p5, %p2335_p4 }
  0x10   :  { %p2338_p7 = pnand %p2337_p6, %p2331_p3 }
  0x12   :  { %2341 = shalt.err (!%p2338_p7)
}
  0x13   :  { %s2462_s21 = smov 128   ;;  %s2463_s22 = smov 8  }
  0x14   :  { %45 = dma.hbm_to_vmem [thread:$0]  %s3179_s3, 2048, %s40_s10, [#allocation6], %s2462_s21, %s2462_s21, %s2463_s22  }
  0x15   :  { %s2342_s27 = scalar_lea.hbm %s3182_s6, 2048 }
  0x16   :  { %p2343_p8 = scmp.ne.s32.totalorder %s3182_s6, %s2342_s27  ;;  %p2346_p9 = scmp.lt.u32.totalorder %s2342_s27, %s3182_s6 }
  0x18   :  { %p2348_p10 = pnand %p2346_p9, %p2343_p8 }
  0x1a   :  { %2351 = shalt.err (!%p2348_p10)
}
  0x1b   :  { %s2352_s13 = scalar_lea.vmem %s2519_s12, 2048  ;;  %p2357_p12 = scmp.lt.s32.totalorder %s2519_s12, %s2519_s12 }
  0x1c   :  { %p2353_p11 = scmp.ne.s32.totalorder %s2519_s12, %s2352_s13  ;;  %p2358_p13 = scmp.lt.s32.totalorder %s2352_s13, %s2352_s13 }
  0x1e   :  { %p2359_p0 = por %p2358_p13, %p2357_p12 }
  0x20   :  { %p2360_p1 = pnand %p2359_p0, %p2353_p11 }
  0x22   :  { %2363 = shalt.err (!%p2360_p1)
}
  0x23   :  { %71 = dma.hbm_to_vmem [thread:$0]  %s3182_s6, 2048, %s2519_s12, [#allocation9], %s2462_s21, %s2462_s21, %s2463_s22  }
  0x24   :  { %s2464_s14 = smov [#allocation2]   ;;  %s2465_s16 = smov [#allocation7]  }
  0x25   :  { %s23_s15 = sshll.u32 %s2464_s14, 4  ;;  %s51_s17 = sshll.u32 %s2465_s16, 4  ;;  %s24_s15 = int_to_ptr.vmem [resolvable:$true] %s23_s15  ;;  %s2556_s17 = int_to_ptr.vmem [resolvable:$true] %s51_s17 }
  0x26   :  { %s2364_s20 = scalar_lea.hbm %s3176_s0, 512 }
  0x27   :  { %p2365_p2 = scmp.ne.s32.totalorder %s3176_s0, %s2364_s20  ;;  %p2368_p3 = scmp.lt.u32.totalorder %s2364_s20, %s3176_s0 }
  0x29   :  { %p2370_p4 = pnand %p2368_p3, %p2365_p2 }
  0x2b   :  { %2373 = shalt.err (!%p2370_p4)
}
  0x2c   :  { %s2374_s6 = scalar_lea.vmem %s24_s15, 512  ;;  %p2379_p6 = scmp.lt.s32.totalorder %s24_s15, %s24_s15 }
  0x2d   :  { %p2375_p5 = scmp.ne.s32.totalorder %s24_s15, %s2374_s6  ;;  %p2380_p7 = scmp.lt.s32.totalorder %s2374_s6, %s2374_s6 }
  0x2f   :  { %p2381_p8 = por %p2380_p7, %p2379_p6 }
  0x31   :  { %p2382_p9 = pnand %p2381_p8, %p2375_p5 }
  0x33   :  { %2385 = shalt.err (!%p2382_p9)
}
  0x34   :  { %29 = dma.hbm_to_vmem [thread:$0]  %s3176_s0, 512, %s24_s15, [#allocation3], %s2462_s21, %s2462_s21, %s2463_s22  }
  0x35   :  { %s2386_s30 = scalar_lea.hbm %s3180_s4, 2048 }
  0x36   :  { %p2387_p10 = scmp.ne.s32.totalorder %s3180_s4, %s2386_s30  ;;  %p2390_p11 = scmp.lt.u32.totalorder %s2386_s30, %s3180_s4 }
  0x38   :  { %p2392_p12 = pnand %p2390_p11, %p2387_p10 }
  0x3a   :  { %2395 = shalt.err (!%p2392_p12)
}
  0x3b   :  { %s2396_s14 = scalar_lea.vmem %s2556_s17, 2048  ;;  %p2401_p0 = scmp.lt.s32.totalorder %s2556_s17, %s2556_s17 }
  0x3c   :  { %p2397_p13 = scmp.ne.s32.totalorder %s2556_s17, %s2396_s14  ;;  %p2402_p1 = scmp.lt.s32.totalorder %s2396_s14, %s2396_s14 }
  0x3e   :  { %p2403_p2 = por %p2402_p1, %p2401_p0 }
  0x40   :  { %p2404_p3 = pnand %p2403_p2, %p2397_p13 }
  0x42   :  { %2407 = shalt.err (!%p2404_p3)
}
  0x43   :  { %57 = dma.hbm_to_vmem [thread:$0]  %s3180_s4, 2048, %s2556_s17, [#allocation6], %s2462_s21, %s2462_s21, %s2463_s22  }
  0x44   :  { %s2466_s16 = smov [#allocation10]   ;;  %s2408_s23 = scalar_lea.hbm %s3183_s7, 2048 }
  0x45   :  { %s77_s18 = sshll.u32 %s2466_s16, 4  ;;  %p2409_p4 = scmp.ne.s32.totalorder %s3183_s7, %s2408_s23  ;;  %s78_s18 = int_to_ptr.vmem [resolvable:$true] %s77_s18 }
  0x46   :  { %p2412_p5 = scmp.lt.u32.totalorder %s2408_s23, %s3183_s7 }
  0x48   :  { %p2414_p6 = pnand %p2412_p5, %p2409_p4 }
  0x4a   :  { %2417 = shalt.err (!%p2414_p6)
}
  0x4b   :  { %s2418_s12 = scalar_lea.vmem %s78_s18, 2048  ;;  %p2423_p8 = scmp.lt.s32.totalorder %s78_s18, %s78_s18 }
  0x4c   :  { %p2419_p7 = scmp.ne.s32.totalorder %s78_s18, %s2418_s12  ;;  %p2424_p9 = scmp.lt.s32.totalorder %s2418_s12, %s2418_s12 }
  0x4e   :  { %p2425_p10 = por %p2424_p9, %p2423_p8 }
  0x50   :  { %p2426_p11 = pnand %p2425_p10, %p2419_p7 }
  0x52   :  { %2429 = shalt.err (!%p2426_p11)
}
  0x53   :  { %83 = dma.hbm_to_vmem [thread:$0]  %s3183_s7, 2048, %s78_s18, [#allocation9], %s2462_s21, %s2462_s21, %s2463_s22  }
  0x54   :  { %2452 = dma.done.wait [#allocation3], 512  }
  0x55   :  { %2453 = vsyncadd [#allocation3], 4294966784 }
  0x56   :  { %2454 = dma.done.wait [#allocation6], 4096  }
  0x57   :  { %2455 = vsyncadd [#allocation6], 4294963200 }
  0x58   :  { %2456 = dma.done.wait [#allocation9], 4096  }
  0x59   :  { %2457 = vsyncadd [#allocation9], 4294963200  ;;  %v2467_v0 = vmov 0   ;;  %v2611_v1 = vld [vmem:[%s3178_s2] sm:$0xff]  ;;  %v2616_v2 = vld [vmem:[%s3178_s2 + $0x8] sm:$0xff] }
  0x5a   :  { %2254 = vset.pattern.permute.xlu0 %v2467_v0  ;;  %2255 = vset.pattern.permute.xlu1 %v2467_v0  ;;  %v2621_v3 = vld [vmem:[%s3178_s2 + $0x10] sm:$0xff]  ;;  %v2021_v4 = vpack.c.bf16 %v2616_v2, %v2611_v1  ;;  %v2628_v5 = vld [vmem:[%s3178_s2 + $0x18] sm:$0xff]  ;;  %v2635_v7 = vld [vmem:[%s3178_s2 + $0x20] sm:$0xff] }
  0x5b   :  { %v2025_v6 = vpack.c.bf16 %v2628_v5, %v2621_v3  ;;  %v2640_v8 = vld [vmem:[%s3178_s2 + $0x28] sm:$0xff]  ;;  %v2644_v10 = vld [vmem:[#allocation2] sm:$0xff]  ;;  %v2649_v11 = vld [vmem:[%s3178_s2 + $0x30] sm:$0xff] }
  0x5c   :  { %2022 = vmatprep.subr.bf16.mxu1 %v2021_v4  ;;  %v2029_v9 = vpack.c.bf16 %v2640_v8, %v2635_v7  ;;  %v2654_v12 = vld [vmem:[%s3178_s2 + $0x38] sm:$0xff]  ;;  %v105_v13 = vunpack.c.0.s8 %v2644_v10  ;;  %v137_v14 = vld [vmem:[%s3177_s1] sm:$0xff]  ;;  %v139_v15 = vld [vmem:[%s3177_s1 + $0x10] sm:$0xff]  ;;  %v106_v42 = vunpack.c.1.s8 %v2644_v10  ;;  %v107_v43 = vunpack.c.2.s8 %v2644_v10 }
  0x5d   :  { %2024 = vmatpush3.bf16.msra.mxu1 %v2021_v4  ;;  %316 = vperm.xlu0 %2254, %v137_v14   ;;  %v138_v17 = vld [vmem:[%s3177_s1 + $0x8] sm:$0xff]  ;;  %v2033_v18 = vpack.c.bf16 %v2654_v12, %v2649_v11  ;;  %v140_v19 = vld [vmem:[%s3177_s1 + $0x18] sm:$0xff]  ;;  %v2674_v20 = vld [vmem:[%s3178_s2 + $0x40] sm:$0xff]  ;;  %v108_v49 = vunpack.c.3.s8 %v2644_v10 }
  0x5e   :  { %2026 = vmatprep.subr.bf16.mxu1 %v2025_v6  ;;  %v121_v16 = vcvt.s32.f32 %v105_v13  ;;  %326 = vperm.xlu1 %2255, %v139_v15   ;;  %v2679_v21 = vld [vmem:[%s3178_s2 + $0x48] sm:$0xff]  ;;  %v141_v22 = vld [vmem:[%s3177_s1 + $0x20] sm:$0xff]  ;;  %v2692_v25 = vld [vmem:[%s3178_s2 + $0x50] sm:$0xff]  ;;  %v2751_v48 = vcvt.s32.f32 %v106_v42  ;;  %v2754_v52 = vcvt.s32.f32 %v107_v43 }
  0x5f   :  { %v2037_v23 = vpack.c.bf16 %v2679_v21, %v2674_v20  ;;  %v142_v24 = vld [vmem:[%s3177_s1 + $0x28] sm:$0xff]  ;;  %v2697_v26 = vld [vmem:[%s3178_s2 + $0x58] sm:$0xff]  ;;  %v143_v27 = vld [vmem:[%s3177_s1 + $0x30] sm:$0xff]  ;;  %v2763_v57 = vcvt.s32.f32 %v108_v49 }
  0x60   :  { %1717 = vmatprep.mubr.f32.mxu1 %v121_v16  ;;  %1885 = vmatprep.mubr.f32.mxu0 %v121_v16  ;;  %v2041_v28 = vpack.c.bf16 %v2697_v26, %v2692_v25  ;;  %v144_v29 = vld [vmem:[%s3177_s1 + $0x38] sm:$0xff]  ;;  %v2710_v30 = vld [vmem:[%s3178_s2 + $0x60] sm:$0xff]  ;;  %v2715_v31 = vld [vmem:[%s3178_s2 + $0x68] sm:$0xff] }
  0x61   :  { %2028 = vmatpush3.bf16.msra.mxu1 %v2025_v6  ;;  %321 = vperm.xlu0 %2254, %v138_v17   ;;  %v145_v32 = vld [vmem:[%s3177_s1 + $0x40] sm:$0xff]  ;;  %v2045_v33 = vpack.c.bf16 %v2715_v31, %v2710_v30  ;;  %v146_v34 = vld [vmem:[%s3177_s1 + $0x48] sm:$0xff]  ;;  %v2728_v35 = vld [vmem:[%s3178_s2 + $0x70] sm:$0xff] }
  0x62   :  { %2030 = vmatprep.subr.bf16.mxu1 %v2029_v9  ;;  %331 = vperm.xlu1 %2255, %v140_v19   ;;  %v2733_v36 = vld [vmem:[%s3178_s2 + $0x78] sm:$0xff]  ;;  %v147_v37 = vld [vmem:[%s3177_s1 + $0x50] sm:$0xff]  ;;  %v426_v40 = vld [vmem:[#allocation7] sm:$0xff] }
  0x63   :  { %v2049_v38 = vpack.c.bf16 %v2733_v36, %v2728_v35  ;;  %v148_v39 = vld [vmem:[%s3177_s1 + $0x58] sm:$0xff]  ;;  %v427_v41 = vld [vmem:[#allocation7 + $0x8] sm:$0xff]  ;;  %v149_v44 = vld [vmem:[%s3177_s1 + $0x60] sm:$0xff] }
  0x64   :  { %v102_v45 = vld [vmem:[#allocation2 + $0x8] sm:$0xff]  ;;  %v2053_v47 = vpack.c.bf16 %v427_v41, %v426_v40  ;;  %v428_v50 = vld [vmem:[#allocation7 + $0x10] sm:$0xff]  ;;  %v429_v51 = vld [vmem:[#allocation7 + $0x18] sm:$0xff] }
  0x65   :  { %2032 = vmatpush3.bf16.msra.mxu1 %v2029_v9  ;;  %336 = vperm.xlu0 %2254, %v141_v22   ;;  %v150_v46 = vld [vmem:[%s3177_s1 + $0x68] sm:$0xff]  ;;  %v109_v53 = vunpack.c.0.s8 %v102_v45  ;;  %v151_v54 = vld [vmem:[%s3177_s1 + $0x70] sm:$0xff]  ;;  %v152_v55 = vld [vmem:[%s3177_s1 + $0x78] sm:$0xff]  ;;  %v2057_v56 = vpack.c.bf16 %v429_v51, %v428_v50  ;;  %v110_v58 = vunpack.c.1.s8 %v102_v45  ;;  %v111_v62 = vunpack.c.2.s8 %v102_v45 }
  0x66   :  { %2034 = vmatprep.subr.bf16.mxu1 %v2033_v18  ;;  %341 = vperm.xlu1 %2255, %v142_v24   ;;  %v430_v59 = vld [vmem:[#allocation7 + $0x20] sm:$0xff]  ;;  %v431_v60 = vld [vmem:[#allocation7 + $0x28] sm:$0xff]  ;;  %v103_v63 = vld [vmem:[#allocation2 + $0x10] sm:$0xff]  ;;  %v112_v6 = vunpack.c.3.s8 %v102_v45 }
  0x67   :  { %v2766_v61 = vcvt.s32.f32 %v109_v53  ;;  %v2061_v0 = vpack.c.bf16 %v431_v60, %v430_v59  ;;  %v2769_v4 = vcvt.s32.f32 %v110_v58  ;;  %v432_v9 = vld [vmem:[#allocation7 + $0x30] sm:$0xff]  ;;  %v433_v10 = vld [vmem:[#allocation7 + $0x38] sm:$0xff]  ;;  %v2772_v13 = vcvt.s32.f32 %v111_v62  ;;  %v435_v19 = vld [vmem:[#allocation7 + $0x48] sm:$0xff] }
  0x68   :  { %v113_v14 = vunpack.c.0.s8 %v103_v63  ;;  %v2065_v15 = vpack.c.bf16 %v433_v10, %v432_v9  ;;  %v2775_v16 = vcvt.s32.f32 %v112_v6  ;;  %v114_v17 = vunpack.c.1.s8 %v103_v63  ;;  %v104_v24 = vld [vmem:[#allocation2 + $0x18] sm:$0xff]  ;;  %v438_v41 = vld [vmem:[#allocation7 + $0x60] sm:$0xff]  ;;  %v439_v42 = vld [vmem:[#allocation7 + $0x68] sm:$0xff] }
  0x69   :  { %2036 = vmatpush3.bf16.msra.mxu1 %v2033_v18  ;;  %346 = vperm.xlu0 %2254, %v143_v27   ;;  %v434_v18 = vld [vmem:[#allocation7 + $0x40] sm:$0xff]  ;;  %v118_v40 = vunpack.c.1.s8 %v104_v24  ;;  %v2077_v45 = vpack.c.bf16 %v439_v42, %v438_v41  ;;  %v440_v49 = vld [vmem:[#allocation7 + $0x70] sm:$0xff]  ;;  %v441_v50 = vld [vmem:[#allocation7 + $0x78] sm:$0xff] }
  0x6a   :  { %2038 = vmatprep.subr.bf16.mxu1 %v2037_v23  ;;  %351 = vperm.xlu1 %2255, %v144_v29   ;;  %v2778_v22 = vcvt.s32.f32 %v113_v14  ;;  %v2069_v27 = vpack.c.bf16 %v435_v19, %v434_v18  ;;  %v116_v29 = vunpack.c.3.s8 %v103_v63  ;;  %v2081_v53 = vpack.c.bf16 %v441_v50, %v440_v49  ;;  %v412_v59 = vld [vmem:[#allocation5 + $0x10] sm:$0xff]  ;;  %v413_v60 = vld [vmem:[#allocation5 + $0x18] sm:$0xff]  ;;  %v418_v14 = vld [vmem:[#allocation5 + $0x40] sm:$0xff] }
  0x6b   :  { %v2089_v62 = vpack.c.bf16 %v413_v60, %v412_v59  ;;  %v416_v9 = vld [vmem:[#allocation5 + $0x30] sm:$0xff]  ;;  %v417_v10 = vld [vmem:[#allocation5 + $0x38] sm:$0xff]  ;;  %v423_v18 = vld [vmem:[#allocation5 + $0x68] sm:$0xff] }
  0x6d   :  { %2040 = vmatpush3.bf16.msra.mxu1 %v2037_v23  ;;  %356 = vperm.xlu0 %2254, %v145_v32   ;;  %v115_v23 = vunpack.c.2.s8 %v103_v63  ;;  %v436_v32 = vld [vmem:[#allocation7 + $0x50] sm:$0xff]  ;;  %v414_v63 = vld [vmem:[#allocation5 + $0x20] sm:$0xff] }
  0x6e   :  { %2042 = vmatprep.subr.bf16.mxu1 %v2041_v28  ;;  %361 = vperm.xlu1 %2255, %v146_v34  }
  0x6f   :  { %v2784_v34 = vcvt.s32.f32 %v115_v23 }
  0x71   :  { %2044 = vmatpush3.bf16.msra.mxu1 %v2041_v28  ;;  %366 = vperm.xlu0 %2254, %v147_v37   ;;  %v2781_v28 = vcvt.s32.f32 %v114_v17  ;;  %v117_v37 = vunpack.c.0.s8 %v104_v24  ;;  %v421_v17 = vld [vmem:[#allocation5 + $0x58] sm:$0xff] }
  0x72   :  { %2046 = vmatprep.subr.bf16.mxu1 %v2045_v33  ;;  %371 = vperm.xlu1 %2255, %v148_v39   ;;  %v2787_v39 = vcvt.s32.f32 %v116_v29 }
  0x73   :  { %v2790_v43 = vcvt.s32.f32 %v117_v37 }
  0x75   :  { %2048 = vmatpush3.bf16.msra.mxu1 %v2045_v33  ;;  %376 = vperm.xlu0 %2254, %v149_v44   ;;  %v437_v33 = vld [vmem:[#allocation7 + $0x58] sm:$0xff]  ;;  %v119_v44 = vunpack.c.2.s8 %v104_v24 }
  0x76   :  { %2050 = vmatprep.subr.bf16.mxu1 %v2049_v38  ;;  %381 = vperm.xlu1 %2255, %v150_v46   ;;  %v2793_v46 = vcvt.s32.f32 %v118_v40 }
  0x77   :  { %v2796_v51 = vcvt.s32.f32 %v119_v44 }
  0x79   :  { %2052 = vmatpush3.bf16.msra.mxu1 %v2049_v38  ;;  %386 = vperm.xlu0 %2254, %v151_v54   ;;  %v2073_v38 = vpack.c.bf16 %v437_v33, %v436_v32 }
  0x7a   :  { %2054 = vmatprep.subr.bf16.mxu1 %v2053_v47  ;;  %391 = vperm.xlu1 %2255, %v152_v55   ;;  %v410_v55 = vld [vmem:[#allocation5] sm:$0xff] }
  0x7c   :  { %1718 = vmatmul.mubr.f32.vlgmr.msra.gmra.mrb[0].mxu1 %v2751_v48 }
  0x7d   :  { %1720 = vmatprep.mubr.f32.mxu1 %v2754_v52  ;;  %2056 = vmatpush3.bf16.msra.mxu1 %v2053_v47  ;;  %v120_v47 = vunpack.c.3.s8 %v104_v24 }
  0x7e   :  { %2058 = vmatprep.subr.bf16.mxu1 %v2057_v56 }
  0x7f   :  { %v2799_v54 = vcvt.s32.f32 %v120_v47 }
  0x80   :  { %1721 = vmatmul.mubr.f32.gmra.mrb[2].mxu1 %v2763_v57 }
  0x81   :  { %1723 = vmatprep.mubr.f32.mxu1 %v2766_v61  ;;  %2060 = vmatpush3.bf16.msra.mxu1 %v2057_v56  ;;  %v411_v56 = vld [vmem:[#allocation5 + $0x8] sm:$0xff] }
  0x82   :  { %2062 = vmatprep.subr.bf16.mxu1 %v2061_v0  ;;  %v2085_v58 = vpack.c.bf16 %v411_v56, %v410_v55 }
  0x84   :  { %1724 = vmatmul.mubr.f32.gmra.mrb[4].mxu1 %v2769_v4 }
  0x85   :  { %1726 = vmatprep.mubr.f32.mxu1 %v2772_v13  ;;  %2064 = vmatpush3.bf16.msra.mxu1 %v2061_v0  ;;  %v415_v0 = vld [vmem:[#allocation5 + $0x28] sm:$0xff] }
  0x86   :  { %2066 = vmatprep.subr.bf16.mxu1 %v2065_v15  ;;  %v2093_v6 = vpack.c.bf16 %v415_v0, %v414_v63 }
  0x88   :  { %1727 = vmatmul.mubr.f32.gmra.mrb[6].mxu1 %v2775_v16 }
  0x89   :  { %1729 = vmatprep.mubr.f32.mxu1 %v2778_v22  ;;  %2068 = vmatpush3.bf16.msra.mxu1 %v2065_v15  ;;  %v419_v15 = vld [vmem:[#allocation5 + $0x48] sm:$0xff] }
  0x8a   :  { %2070 = vmatprep.subr.bf16.mxu1 %v2069_v27 }
  0x8c   :  { %1730 = vmatmul.mubr.f32.gmra.mrb[8].mxu1 %v2781_v28 }
  0x8d   :  { %1732 = vmatprep.mubr.f32.mxu1 %v2784_v34  ;;  %2072 = vmatpush3.bf16.msra.mxu1 %v2069_v27 }
  0x8e   :  { %2074 = vmatprep.subr.bf16.mxu1 %v2073_v38 }
  0x90   :  { %1733 = vmatmul.mubr.f32.gmra.mrb[10].mxu1 %v2787_v39 }
  0x91   :  { %1735 = vmatprep.mubr.f32.mxu1 %v2790_v43  ;;  %2076 = vmatpush3.bf16.msra.mxu1 %v2073_v38 }
  0x92   :  { %2078 = vmatprep.subr.bf16.mxu1 %v2077_v45 }
  0x94   :  { %1736 = vmatmul.mubr.f32.gmra.mrb[12].mxu1 %v2793_v46 }
  0x95   :  { %1738 = vmatprep.mubr.f32.mxu1 %v2796_v51  ;;  %2080 = vmatpush3.bf16.msra.mxu1 %v2077_v45 }
  0x96   :  { %2082 = vmatprep.subr.bf16.mxu1 %v2081_v53 }
  0x98   :  { %1739 = vmatmul.mubr.f32.gmra.mrb[14].mxu1 %v2799_v54 }
  0x99   :  { %1773 = vmatprep.mubr.f32.mxu1 %v2611_v1  ;;  %2084 = vmatpush3.bf16.msra.mxu1 %v2081_v53  ;;  %v2097_v1 = vpack.c.bf16 %v417_v10, %v416_v9 }
  0x9a   :  { %2086 = vmatprep.subr.bf16.mxu1 %v2085_v58 }
  0x9c   :  { %1774 = vmatmul.mubr.f32.vlgmr.msra.gmra.mrb[16].mxu1 %v2616_v2  ;;  %v2101_v2 = vpack.c.bf16 %v419_v15, %v418_v14 }
  0x9d   :  { %2088 = vmatpush3.bf16.msra.mxu1 %v2085_v58  ;;  %1776 = vmatprep.mubr.f32.mxu1 %v2621_v3  ;;  %v420_v3 = vld [vmem:[#allocation5 + $0x50] sm:$0xff] }
  0x9e   :  { %2090 = vmatprep.subr.bf16.mxu1 %v2089_v62 }
  0xa0   :  { %1777 = vmatmul.mubr.f32.gmra.mrb[18].mxu1 %v2628_v5  ;;  %v2105_v5 = vpack.c.bf16 %v421_v17, %v420_v3 }
  0xa1   :  { %2092 = vmatpush3.bf16.msra.mxu1 %v2089_v62  ;;  %1779 = vmatprep.mubr.f32.mxu1 %v2635_v7  ;;  %v422_v7 = vld [vmem:[#allocation5 + $0x60] sm:$0xff] }
  0xa2   :  { %2094 = vmatprep.subr.bf16.mxu1 %v2093_v6 }
  0xa4   :  { %1780 = vmatmul.mubr.f32.gmra.mrb[20].mxu1 %v2640_v8  ;;  %v2109_v8 = vpack.c.bf16 %v423_v18, %v422_v7 }
  0xa5   :  { %2096 = vmatpush3.bf16.msra.mxu1 %v2093_v6  ;;  %1782 = vmatprep.mubr.f32.mxu1 %v2649_v11  ;;  %v424_v11 = vld [vmem:[#allocation5 + $0x70] sm:$0xff] }
  0xa6   :  { %2098 = vmatprep.subr.bf16.mxu1 %v2097_v1 }
  0xa8   :  { %1783 = vmatmul.mubr.f32.gmra.mrb[22].mxu1 %v2654_v12  ;;  %v425_v12 = vld [vmem:[#allocation5 + $0x78] sm:$0xff] }
  0xa9   :  { %2100 = vmatpush3.bf16.msra.mxu1 %v2097_v1  ;;  %1785 = vmatprep.mubr.f32.mxu1 %v2674_v20  ;;  %v2113_v20 = vpack.c.bf16 %v425_v12, %v424_v11 }
  0xaa   :  { %2102 = vmatprep.subr.bf16.mxu1 %v2101_v2 }
  0xac   :  { %1786 = vmatmul.mubr.f32.gmra.mrb[24].mxu1 %v2679_v21 }
  0xad   :  { %2104 = vmatpush3.bf16.msra.mxu1 %v2101_v2  ;;  %1788 = vmatprep.mubr.f32.mxu1 %v2692_v25 }
  0xae   :  { %2106 = vmatprep.subr.bf16.mxu1 %v2105_v5 }
  0xb0   :  { %1789 = vmatmul.mubr.f32.gmra.mrb[26].mxu1 %v2697_v26 }
  0xb1   :  { %2108 = vmatpush3.bf16.msra.mxu1 %v2105_v5  ;;  %1791 = vmatprep.mubr.f32.mxu1 %v2710_v30 }
  0xb2   :  { %2110 = vmatprep.subr.bf16.mxu1 %v2109_v8 }
  0xb4   :  { %1792 = vmatmul.mubr.f32.gmra.mrb[28].mxu1 %v2715_v31 }
  0xb5   :  { %2112 = vmatpush3.bf16.msra.mxu1 %v2109_v8  ;;  %1794 = vmatprep.mubr.f32.mxu1 %v2728_v35 }
  0xb6   :  { %2114 = vmatprep.subr.bf16.mxu1 %v2113_v20 }
  0xb8   :  { %1795 = vmatmul.mubr.f32.gmra.mrb[30].mxu1 %v2733_v36 }
  0xb9   :  { %2116 = vmatpush3.bf16.msra.mxu1 %v2113_v20  ;;  %v2870_v20 = vld [vmem:[%s3181_s5] ss:$0 sm:$0xff] }
  0xdc   :  { %v2819_v21 = vpop.permute.xlu0 %316 }
  0xdd   :  { %v2821_v25 = vpop.permute.xlu1 %326 }
  0xe0   :  { %v2823_v26 = vpop.permute.xlu0 %321 }
  0xe1   :  { %v2825_v30 = vpop.permute.xlu1 %331 }
  0xe4   :  { %v2827_v19 = vpop.permute.xlu0 %336 }
  0xe5   :  { %v2829_v31 = vpop.permute.xlu1 %341 }
  0xe8   :  { %v2833_v29 = vpop.permute.xlu0 %346 }
  0xe9   :  { %v2835_v33 = vpop.permute.xlu1 %351 }
  0xec   :  { %v2840_v44 = vpop.permute.xlu0 %356 }
  0xed   :  { %v2843_v47 = vpop.permute.xlu1 %361 }
  0xf0   :  { %v2847_v58 = vpop.permute.xlu0 %366 }
  0xf1   :  { %v2849_v60 = vpop.permute.xlu1 %371 }
  0xf4   :  { %v2854_v10 = vpop.permute.xlu0 %376 }
  0xf5   :  { %v2857_v14 = vpop.permute.xlu1 %381 }
  0xf8   :  { %v2861_v7 = vpop.permute.xlu0 %386 }
  0xf9   :  { %v2863_v8 = vpop.permute.xlu1 %391 }
 0x14f   :  { %v1719_v35 = vpop.f32.mrb[0].mxu1 }
 0x150   :  { %v235_v23 = vpop.f32.mrb[1].mxu1  ;;  %v395_v24 = vmul.f32 %v1719_v35, %v2823_v26 }
 0x151   :  { %v394_v36 = vmul.f32 %v2819_v21, %v235_v23 }
 0x153   :  { %v1722_v27 = vpop.f32.mrb[2].mxu1  ;;  %1829 = vmatprep.mubr.f32.mxu1 %v394_v36 }
 0x154   :  { %v245_v32 = vpop.f32.mrb[3].mxu1  ;;  %1830 = vmatmul.mubr.f32.vlgmr.msra.gmra.mrb[16].mxu1 %v395_v24  ;;  %v397_v38 = vmul.f32 %v1722_v27, %v2825_v30 }
 0x155   :  { %v396_v37 = vmul.f32 %v2821_v25, %v245_v32 }
 0x157   :  { %v1725_v40 = vpop.f32.mrb[4].mxu1  ;;  %1832 = vmatprep.mubr.f32.mxu1 %v396_v37 }
 0x158   :  { %v255_v41 = vpop.f32.mrb[5].mxu1  ;;  %1833 = vmatmul.mubr.f32.gmra.mrb[18].mxu1 %v397_v38  ;;  %v399_v45 = vmul.f32 %v1725_v40, %v2829_v31 }
 0x159   :  { %v398_v42 = vmul.f32 %v2827_v19, %v255_v41 }
 0x15b   :  { %v1728_v49 = vpop.f32.mrb[6].mxu1  ;;  %1835 = vmatprep.mubr.f32.mxu1 %v398_v42 }
 0x15c   :  { %v265_v50 = vpop.f32.mrb[7].mxu1  ;;  %1836 = vmatmul.mubr.f32.gmra.mrb[20].mxu1 %v399_v45  ;;  %v401_v55 = vmul.f32 %v1728_v49, %v2835_v33 }
 0x15d   :  { %v400_v53 = vmul.f32 %v2833_v29, %v265_v50 }
 0x15f   :  { %v1731_v56 = vpop.f32.mrb[8].mxu1  ;;  %1838 = vmatprep.mubr.f32.mxu1 %v400_v53 }
 0x160   :  { %v275_v59 = vpop.f32.mrb[9].mxu1  ;;  %1839 = vmatmul.mubr.f32.gmra.mrb[22].mxu1 %v401_v55  ;;  %v403_v63 = vmul.f32 %v1731_v56, %v2843_v47 }
 0x161   :  { %v402_v62 = vmul.f32 %v2840_v44, %v275_v59 }
 0x163   :  { %v1734_v0 = vpop.f32.mrb[10].mxu1  ;;  %1841 = vmatprep.mubr.f32.mxu1 %v402_v62 }
 0x164   :  { %v285_v6 = vpop.f32.mrb[11].mxu1  ;;  %1842 = vmatmul.mubr.f32.gmra.mrb[24].mxu1 %v403_v63  ;;  %v405_v1 = vmul.f32 %v1734_v0, %v2849_v60 }
 0x165   :  { %v404_v9 = vmul.f32 %v2847_v58, %v285_v6 }
 0x167   :  { %v1737_v15 = vpop.f32.mrb[12].mxu1  ;;  %1844 = vmatprep.mubr.f32.mxu1 %v404_v9 }
 0x168   :  { %v295_v2 = vpop.f32.mrb[13].mxu1  ;;  %1845 = vmatmul.mubr.f32.gmra.mrb[26].mxu1 %v405_v1  ;;  %v407_v17 = vmul.f32 %v1737_v15, %v2857_v14 }
 0x169   :  { %v406_v3 = vmul.f32 %v2854_v10, %v295_v2 }
 0x16b   :  { %v1740_v5 = vpop.f32.mrb[14].mxu1  ;;  %1847 = vmatprep.mubr.f32.mxu1 %v406_v3 }
 0x16c   :  { %v305_v18 = vpop.f32.mrb[15].mxu1  ;;  %1848 = vmatmul.mubr.f32.gmra.mrb[28].mxu1 %v407_v17  ;;  %v409_v12 = vmul.f32 %v1740_v5, %v2863_v8 }
 0x16d   :  { %v408_v11 = vmul.f32 %v2861_v7, %v305_v18 }
 0x16f   :  { %1850 = vmatprep.mubr.f32.mxu1 %v408_v11 }
 0x170   :  { %1851 = vmatmul.mubr.f32.gmra.mrb[30].mxu1 %v409_v12 }
 0x227   :  { %v1831_v35 = vpop.f32.mrb[16].mxu1 }
 0x228   :  { %v2873_v23 = vadd.f32 %v1831_v35, %v2870_v20  ;;  %v653_v36 = vpop.f32.mrb[17].mxu1 }
 0x229   :  { %v2876_v24 = vadd.f32 %v2870_v20, %v653_v36 }
 0x22a   :  { %v756_v27 = vmax.f32 %v2873_v23, 0.0  ;;  %v941_v23 = vld [vmem:[#allocation8 + $0x48] sm:$0xff] }
 0x22b   :  { %v755_v32 = vmax.f32 %v2876_v24, 0.0  ;;  %v1834_v37 = vpop.f32.mrb[18].mxu1 }
 0x22c   :  { %v2881_v38 = vadd.f32 %v1834_v37, %v2870_v20  ;;  %v663_v40 = vpop.f32.mrb[19].mxu1 }
 0x22d   :  { %v2884_v41 = vadd.f32 %v2870_v20, %v663_v40  ;;  %v2117_v42 = vpack.c.bf16 %v756_v27, %v755_v32 }
 0x22e   :  { %v3196_v45 = vmax.f32 %v2881_v38, 0.0 }
 0x22f   :  { %v757_v49 = vmax.f32 %v2884_v41, 0.0  ;;  %v1837_v50 = vpop.f32.mrb[20].mxu1  ;;  %2118 = vmatprep.subr.bf16.mxu0 %v2117_v42 }
 0x230   :  { %v2893_v53 = vadd.f32 %v1837_v50, %v2870_v20  ;;  %v673_v55 = vpop.f32.mrb[21].mxu1  ;;  %2120 = vmatpush3.bf16.msra.mxu0 %v2117_v42 }
 0x231   :  { %v2121_v56 = vpack.c.bf16 %v3196_v45, %v757_v49  ;;  %v2900_v59 = vadd.f32 %v2870_v20, %v673_v55  ;;  %v955_v45 = vld [vmem:[#allocation10 + $0x38] sm:$0xff] }
 0x232   :  { %v3192_v62 = vmax.f32 %v2893_v53, 0.0 }
 0x233   :  { %v3193_v63 = vmax.f32 %v2900_v59, 0.0  ;;  %v1840_v0 = vpop.f32.mrb[22].mxu1  ;;  %2122 = vmatprep.subr.bf16.mxu0 %v2121_v56  ;;  %v3198_v24 = vmax.f32 %v2900_v59, 0.0 }
 0x234   :  { %v2905_v6 = vadd.f32 %v1840_v0, %v2870_v20  ;;  %v683_v9 = vpop.f32.mrb[23].mxu1  ;;  %2124 = vmatpush3.bf16.msra.mxu0 %v2121_v56 }
 0x235   :  { %v2125_v1 = vpack.c.bf16 %v3192_v62, %v3193_v63  ;;  %v2912_v15 = vadd.f32 %v2870_v20, %v683_v9  ;;  %v950_v62 = vld [vmem:[#allocation10 + $0x10] sm:$0xff]  ;;  %v951_v63 = vld [vmem:[#allocation10 + $0x18] sm:$0xff] }
 0x236   :  { %v3190_v2 = vmax.f32 %v2905_v6, 0.0 }
 0x237   :  { %v3191_v3 = vmax.f32 %v2912_v15, 0.0  ;;  %v1843_v17 = vpop.f32.mrb[24].mxu1  ;;  %2126 = vmatprep.subr.bf16.mxu0 %v2125_v1  ;;  %v3200_v41 = vmax.f32 %v2912_v15, 0.0 }
 0x238   :  { %v2917_v5 = vadd.f32 %v1843_v17, %v2870_v20  ;;  %v693_v18 = vpop.f32.mrb[25].mxu1  ;;  %2128 = vmatpush3.bf16.msra.mxu0 %v2125_v1 }
 0x239   :  { %v2129_v11 = vpack.c.bf16 %v3190_v2, %v3191_v3  ;;  %v2924_v12 = vadd.f32 %v2870_v20, %v693_v18  ;;  %v949_v2 = vld [vmem:[#allocation10 + $0x8] sm:$0xff] }
 0x23a   :  { %v3186_v35 = vmax.f32 %v2917_v5, 0.0 }
 0x23b   :  { %v3187_v36 = vmax.f32 %v2924_v12, 0.0  ;;  %v1846_v37 = vpop.f32.mrb[26].mxu1  ;;  %2130 = vmatprep.subr.bf16.mxu0 %v2129_v11  ;;  %v3202_v59 = vmax.f32 %v2924_v12, 0.0 }
 0x23c   :  { %v2929_v40 = vadd.f32 %v1846_v37, %v2870_v20  ;;  %v703_v42 = vpop.f32.mrb[27].mxu1  ;;  %2132 = vmatpush3.bf16.msra.mxu0 %v2129_v11 }
 0x23d   :  { %v2133_v50 = vpack.c.bf16 %v3186_v35, %v3187_v36  ;;  %v2936_v55 = vadd.f32 %v2870_v20, %v703_v42 }
 0x23e   :  { %v3188_v56 = vmax.f32 %v2929_v40, 0.0 }
 0x23f   :  { %v3189_v0 = vmax.f32 %v2936_v55, 0.0  ;;  %v1849_v9 = vpop.f32.mrb[28].mxu1  ;;  %2134 = vmatprep.subr.bf16.mxu0 %v2133_v50  ;;  %v3204_v15 = vmax.f32 %v2936_v55, 0.0  ;;  %v947_v55 = vld [vmem:[#allocation8 + $0x78] sm:$0xff] }
 0x240   :  { %v2941_v1 = vadd.f32 %v1849_v9, %v2870_v20  ;;  %v713_v17 = vpop.f32.mrb[29].mxu1  ;;  %2136 = vmatpush3.bf16.msra.mxu0 %v2133_v50 }
 0x241   :  { %v2137_v18 = vpack.c.bf16 %v3188_v56, %v3189_v0  ;;  %v2948_v11 = vadd.f32 %v2870_v20, %v713_v17  ;;  %v948_v0 = vld [vmem:[#allocation10] sm:$0xff] }
 0x242   :  { %v3194_v37 = vmax.f32 %v2941_v1, 0.0 }
 0x243   :  { %v3195_v42 = vmax.f32 %v2948_v11, 0.0  ;;  %v1852_v35 = vpop.f32.mrb[30].mxu1  ;;  %2138 = vmatprep.subr.bf16.mxu0 %v2137_v18  ;;  %v3206_v12 = vmax.f32 %v2948_v11, 0.0 }
 0x244   :  { %v2953_v36 = vadd.f32 %v1852_v35, %v2870_v20  ;;  %v723_v9 = vpop.f32.mrb[31].mxu1  ;;  %2140 = vmatpush3.bf16.msra.mxu0 %v2137_v18  ;;  %v2149_v18 = vpack.c.bf16 %v949_v2, %v948_v0  ;;  %v956_v0 = vld [vmem:[#allocation10 + $0x40] sm:$0xff] }
 0x245   :  { %v2141_v50 = vpack.c.bf16 %v3194_v37, %v3195_v42  ;;  %v2960_v56 = vadd.f32 %v2870_v20, %v723_v9  ;;  %v2153_v20 = vpack.c.bf16 %v951_v63, %v950_v62  ;;  %v952_v9 = vld [vmem:[#allocation10 + $0x20] sm:$0xff]  ;;  %v953_v37 = vld [vmem:[#allocation10 + $0x28] sm:$0xff]  ;;  %v954_v42 = vld [vmem:[#allocation10 + $0x30] sm:$0xff] }
 0x246   :  { %v770_v17 = vmax.f32 %v2953_v36, 0.0  ;;  %v2161_v2 = vpack.c.bf16 %v955_v45, %v954_v42  ;;  %v957_v62 = vld [vmem:[#allocation10 + $0x48] sm:$0xff]  ;;  %v959_v63 = vld [vmem:[#allocation10 + $0x58] sm:$0xff] }
 0x247   :  { %v769_v3 = vmax.f32 %v2960_v56, 0.0  ;;  %2142 = vmatprep.subr.bf16.mxu0 %v2141_v50  ;;  %v961_v45 = vld [vmem:[#allocation10 + $0x68] sm:$0xff] }
 0x248   :  { %2144 = vmatpush3.bf16.msra.mxu0 %v2141_v50  ;;  %v2157_v50 = vpack.c.bf16 %v953_v37, %v952_v9  ;;  %v963_v37 = vld [vmem:[#allocation10 + $0x78] sm:$0xff]  ;;  %v933_v42 = vld [vmem:[#allocation8 + $0x8] sm:$0xff]  ;;  %v940_v9 = vld [vmem:[#allocation8 + $0x40] sm:$0xff] }
 0x249   :  { %v2145_v35 = vpack.c.bf16 %v770_v17, %v769_v3 }
 0x24b   :  { %2146 = vmatprep.subr.bf16.mxu0 %v2145_v35 }
 0x24c   :  { %2148 = vmatpush3.bf16.msra.mxu0 %v2145_v35  ;;  %v935_v35 = vld [vmem:[#allocation8 + $0x18] sm:$0xff] }
 0x24d   :  { %2150 = vmatprep.subr.bf16.mxu0 %v2149_v18 }
 0x24f   :  { %1886 = vmatmul.mubr.f32.vlgmr.msra.gmra.mrb[0].mxu0 %v2751_v48  ;;  %v2165_v48 = vpack.c.bf16 %v957_v62, %v956_v0  ;;  %v944_v62 = vld [vmem:[#allocation8 + $0x60] sm:$0xff] }
 0x250   :  { %2152 = vmatpush3.bf16.msra.mxu0 %v2149_v18  ;;  %1888 = vmatprep.mubr.f32.mxu0 %v2754_v52  ;;  %v958_v52 = vld [vmem:[#allocation10 + $0x50] sm:$0xff]  ;;  %v937_v18 = vld [vmem:[#allocation8 + $0x28] sm:$0xff] }
 0x251   :  { %2154 = vmatprep.subr.bf16.mxu0 %v2153_v20 }
 0x253   :  { %1889 = vmatmul.mubr.f32.gmra.mrb[2].mxu0 %v2763_v57  ;;  %v2169_v57 = vpack.c.bf16 %v959_v63, %v958_v52  ;;  %v3207_v63 = vmax.f32 %v2941_v1, 0.0 }
 0x254   :  { %2156 = vmatpush3.bf16.msra.mxu0 %v2153_v20  ;;  %1891 = vmatprep.mubr.f32.mxu0 %v2766_v61  ;;  %v960_v61 = vld [vmem:[#allocation10 + $0x60] sm:$0xff]  ;;  %v939_v20 = vld [vmem:[#allocation8 + $0x38] sm:$0xff] }
 0x255   :  { %2158 = vmatprep.subr.bf16.mxu0 %v2157_v50 }
 0x257   :  { %1892 = vmatmul.mubr.f32.gmra.mrb[4].mxu0 %v2769_v4  ;;  %v2173_v4 = vpack.c.bf16 %v961_v45, %v960_v61 }
 0x258   :  { %2160 = vmatpush3.bf16.msra.mxu0 %v2157_v50  ;;  %1894 = vmatprep.mubr.f32.mxu0 %v2772_v13  ;;  %v962_v13 = vld [vmem:[#allocation10 + $0x70] sm:$0xff] }
 0x259   :  { %2162 = vmatprep.subr.bf16.mxu0 %v2161_v2  ;;  %v942_v50 = vld [vmem:[#allocation8 + $0x50] sm:$0xff] }
 0x25b   :  { %1895 = vmatmul.mubr.f32.gmra.mrb[6].mxu0 %v2775_v16  ;;  %v2177_v16 = vpack.c.bf16 %v963_v37, %v962_v13 }
 0x25c   :  { %2164 = vmatpush3.bf16.msra.mxu0 %v2161_v2  ;;  %1897 = vmatprep.mubr.f32.mxu0 %v2778_v22  ;;  %v932_v22 = vld [vmem:[#allocation8] sm:$0xff]  ;;  %v3201_v2 = vmax.f32 %v2905_v6, 0.0  ;;  %v3205_v6 = vmax.f32 %v2929_v40, 0.0 }
 0x25d   :  { %2166 = vmatprep.subr.bf16.mxu0 %v2165_v48 }
 0x25f   :  { %1898 = vmatmul.mubr.f32.gmra.mrb[8].mxu0 %v2781_v28  ;;  %v2181_v28 = vpack.c.bf16 %v933_v42, %v932_v22 }
 0x260   :  { %2168 = vmatpush3.bf16.msra.mxu0 %v2165_v48  ;;  %1900 = vmatprep.mubr.f32.mxu0 %v2784_v34  ;;  %v934_v34 = vld [vmem:[#allocation8 + $0x10] sm:$0xff]  ;;  %v3203_v48 = vmax.f32 %v2917_v5, 0.0 }
 0x261   :  { %2170 = vmatprep.subr.bf16.mxu0 %v2169_v57  ;;  %v946_v5 = vld [vmem:[#allocation8 + $0x70] sm:$0xff] }
 0x263   :  { %1901 = vmatmul.mubr.f32.gmra.mrb[10].mxu0 %v2787_v39  ;;  %v2185_v39 = vpack.c.bf16 %v935_v35, %v934_v34 }
 0x264   :  { %2172 = vmatpush3.bf16.msra.mxu0 %v2169_v57  ;;  %1903 = vmatprep.mubr.f32.mxu0 %v2790_v43  ;;  %v936_v43 = vld [vmem:[#allocation8 + $0x20] sm:$0xff]  ;;  %v2209_v57 = vpack.c.bf16 %v947_v55, %v946_v5 }
 0x265   :  { %2174 = vmatprep.subr.bf16.mxu0 %v2173_v4 }
 0x267   :  { %1904 = vmatmul.mubr.f32.gmra.mrb[12].mxu0 %v2793_v46  ;;  %v2189_v46 = vpack.c.bf16 %v937_v18, %v936_v43 }
 0x268   :  { %2176 = vmatpush3.bf16.msra.mxu0 %v2173_v4  ;;  %1906 = vmatprep.mubr.f32.mxu0 %v2796_v51  ;;  %v938_v51 = vld [vmem:[#allocation8 + $0x30] sm:$0xff] }
 0x269   :  { %2178 = vmatprep.subr.bf16.mxu0 %v2177_v16 }
 0x26b   :  { %1907 = vmatmul.mubr.f32.gmra.mrb[14].mxu0 %v2799_v54  ;;  %v3197_v54 = vmax.f32 %v2881_v38, 0.0  ;;  %v943_v38 = vld [vmem:[#allocation8 + $0x58] sm:$0xff] }
 0x26c   :  { %2180 = vmatpush3.bf16.msra.mxu0 %v2177_v16  ;;  %1941 = vmatprep.mubr.f32.mxu0 %v755_v32  ;;  %v2193_v32 = vpack.c.bf16 %v939_v20, %v938_v51  ;;  %v2201_v0 = vpack.c.bf16 %v943_v38, %v942_v50  ;;  %v1492_v51 = vld [vmem:[%s3184_s8] ss:$0 sm:$0xff]  ;;  %s2468_s8 = smov [#allocation11]  }
 0x26d   :  { %2182 = vmatprep.subr.bf16.mxu0 %v2181_v28  ;;  %s1477_s24 = sshll.u32 %s2468_s8, 4  ;;  %s1478_s24 = int_to_ptr.vmem [resolvable:$true] %s1477_s24 }
 0x26e   :  { %s2430_s25 = scalar_lea.vmem %s1478_s24, 2048  ;;  %p2435_p13 = scmp.lt.s32.totalorder %s1478_s24, %s1478_s24 }
 0x26f   :  { %1942 = vmatmul.mubr.f32.vlgmr.msra.gmra.mrb[16].mxu0 %v756_v27  ;;  %v3199_v27 = vmax.f32 %v2893_v53, 0.0  ;;  %v945_v53 = vld [vmem:[#allocation8 + $0x68] sm:$0xff]  ;;  %p2431_p12 = scmp.ne.s32.totalorder %s1478_s24, %s2430_s25  ;;  %p2436_p0 = scmp.lt.s32.totalorder %s2430_s25, %s2430_s25 }
 0x270   :  { %1944 = vmatprep.mubr.f32.mxu0 %v757_v49  ;;  %2184 = vmatpush3.bf16.msra.mxu0 %v2181_v28  ;;  %v2197_v49 = vpack.c.bf16 %v941_v23, %v940_v9  ;;  %v2205_v52 = vpack.c.bf16 %v945_v53, %v944_v62 }
 0x271   :  { %2186 = vmatprep.subr.bf16.mxu0 %v2185_v39  ;;  %p2437_p1 = por %p2436_p0, %p2435_p13 }
 0x273   :  { %1945 = vmatmul.mubr.f32.gmra.mrb[18].mxu0 %v3197_v54  ;;  %p2438_p2 = pnand %p2437_p1, %p2431_p12 }
 0x274   :  { %1947 = vmatprep.mubr.f32.mxu0 %v3198_v24  ;;  %2188 = vmatpush3.bf16.msra.mxu0 %v2185_v39 }
 0x275   :  { %2190 = vmatprep.subr.bf16.mxu0 %v2189_v46 }
 0x277   :  { %1948 = vmatmul.mubr.f32.gmra.mrb[20].mxu0 %v3199_v27 }
 0x278   :  { %1950 = vmatprep.mubr.f32.mxu0 %v3200_v41  ;;  %2192 = vmatpush3.bf16.msra.mxu0 %v2189_v46 }
 0x279   :  { %2194 = vmatprep.subr.bf16.mxu0 %v2193_v32 }
 0x27b   :  { %1951 = vmatmul.mubr.f32.gmra.mrb[22].mxu0 %v3201_v2 }
 0x27c   :  { %1953 = vmatprep.mubr.f32.mxu0 %v3202_v59  ;;  %2196 = vmatpush3.bf16.msra.mxu0 %v2193_v32 }
 0x27d   :  { %2198 = vmatprep.subr.bf16.mxu0 %v2197_v49 }
 0x27f   :  { %1954 = vmatmul.mubr.f32.gmra.mrb[24].mxu0 %v3203_v48 }
 0x280   :  { %1956 = vmatprep.mubr.f32.mxu0 %v3204_v15  ;;  %2200 = vmatpush3.bf16.msra.mxu0 %v2197_v49 }
 0x281   :  { %2202 = vmatprep.subr.bf16.mxu0 %v2201_v0 }
 0x283   :  { %1957 = vmatmul.mubr.f32.gmra.mrb[26].mxu0 %v3205_v6 }
 0x284   :  { %1959 = vmatprep.mubr.f32.mxu0 %v3206_v12  ;;  %2204 = vmatpush3.bf16.msra.mxu0 %v2201_v0 }
 0x285   :  { %2206 = vmatprep.subr.bf16.mxu0 %v2205_v52 }
 0x287   :  { %1960 = vmatmul.mubr.f32.gmra.mrb[28].mxu0 %v3207_v63 }
 0x288   :  { %1962 = vmatprep.mubr.f32.mxu0 %v769_v3  ;;  %2208 = vmatpush3.bf16.msra.mxu0 %v2205_v52 }
 0x289   :  { %2210 = vmatprep.subr.bf16.mxu0 %v2209_v57 }
 0x28b   :  { %1963 = vmatmul.mubr.f32.gmra.mrb[30].mxu0 %v770_v17 }
 0x28c   :  { %2212 = vmatpush3.bf16.msra.mxu0 %v2209_v57 }
 0x322   :  { %v1887_v40 = vpop.f32.mrb[0].mxu0 }
 0x323   :  { %v837_v11 = vpop.f32.mrb[1].mxu0  ;;  %v917_v45 = vmul.f32 %v1887_v40, %v2823_v26 }
 0x324   :  { %v916_v61 = vmul.f32 %v837_v11, %v2819_v21 }
 0x326   :  { %v1890_v1 = vpop.f32.mrb[2].mxu0  ;;  %1997 = vmatprep.mubr.f32.mxu0 %v916_v61 }
 0x327   :  { %v847_v4 = vpop.f32.mrb[3].mxu0  ;;  %1998 = vmatmul.mubr.f32.vlgmr.msra.gmra.mrb[16].mxu0 %v917_v45  ;;  %v919_v36 = vmul.f32 %v1890_v1, %v2825_v30 }
 0x328   :  { %v918_v3 = vmul.f32 %v847_v4, %v2821_v25 }
 0x32a   :  { %v1893_v56 = vpop.f32.mrb[4].mxu0  ;;  %2000 = vmatprep.mubr.f32.mxu0 %v918_v3 }
 0x32b   :  { %v857_v17 = vpop.f32.mrb[5].mxu0  ;;  %2001 = vmatmul.mubr.f32.gmra.mrb[18].mxu0 %v919_v36  ;;  %v921_v37 = vmul.f32 %v1893_v56, %v2829_v31 }
 0x32c   :  { %v920_v13 = vmul.f32 %v857_v17, %v2827_v19 }
 0x32e   :  { %v1896_v16 = vpop.f32.mrb[6].mxu0  ;;  %2003 = vmatprep.mubr.f32.mxu0 %v920_v13 }
 0x32f   :  { %v867_v21 = vpop.f32.mrb[7].mxu0  ;;  %2004 = vmatmul.mubr.f32.gmra.mrb[20].mxu0 %v921_v37  ;;  %v923_v22 = vmul.f32 %v1896_v16, %v2835_v33 }
 0x330   :  { %v922_v26 = vmul.f32 %v867_v21, %v2833_v29 }
 0x332   :  { %v1899_v42 = vpop.f32.mrb[8].mxu0  ;;  %2006 = vmatprep.mubr.f32.mxu0 %v922_v26 }
 0x333   :  { %v877_v25 = vpop.f32.mrb[9].mxu0  ;;  %2007 = vmatmul.mubr.f32.gmra.mrb[22].mxu0 %v923_v22  ;;  %v925_v28 = vmul.f32 %v1899_v42, %v2843_v47 }
 0x334   :  { %v924_v30 = vmul.f32 %v877_v25, %v2840_v44 }
 0x336   :  { %v1902_v34 = vpop.f32.mrb[10].mxu0  ;;  %2009 = vmatprep.mubr.f32.mxu0 %v924_v30 }
 0x337   :  { %v887_v19 = vpop.f32.mrb[11].mxu0  ;;  %2010 = vmatmul.mubr.f32.gmra.mrb[24].mxu0 %v925_v28  ;;  %v927_v35 = vmul.f32 %v1902_v34, %v2849_v60 }
 0x338   :  { %v926_v31 = vmul.f32 %v887_v19, %v2847_v58  ;;  %v1277_v58 = vlaneseq }
 0x33a   :  { %v1905_v39 = vpop.f32.mrb[12].mxu0  ;;  %2012 = vmatprep.mubr.f32.mxu0 %v926_v31  ;;  %v3031_v60 = vand.u32 127, %v1277_v58 }
 0x33b   :  { %v897_v29 = vpop.f32.mrb[13].mxu0  ;;  %2013 = vmatmul.mubr.f32.gmra.mrb[26].mxu0 %v927_v35  ;;  %v929_v43 = vmul.f32 %v1905_v39, %v2857_v14 }
 0x33c   :  { %v928_v33 = vmul.f32 %v897_v29, %v2854_v10  ;;  %vm1279_vm0 = vcmp.lt.s32.totalorder %v3031_v60, 8 }
 0x33e   :  { %v1908_v18 = vpop.f32.mrb[14].mxu0  ;;  %2015 = vmatprep.mubr.f32.mxu0 %v928_v33 }
 0x33f   :  { %v907_v44 = vpop.f32.mrb[15].mxu0  ;;  %2016 = vmatmul.mubr.f32.gmra.mrb[28].mxu0 %v929_v43  ;;  %v931_v46 = vmul.f32 %v1908_v18, %v2863_v8 }
 0x340   :  { %v930_v47 = vmul.f32 %v907_v44, %v2861_v7 }
 0x342   :  { %2018 = vmatprep.mubr.f32.mxu0 %v930_v47 }
 0x343   :  { %2019 = vmatmul.mubr.f32.gmra.mrb[30].mxu0 %v931_v46 }
 0x3fa   :  { %v1999_v10 = vpop.f32.mrb[16].mxu0 }
 0x3fb   :  { %v1262_v14 = vadd.f32 %v1999_v10, %v1492_v51  ;;  %v1175_v20 = vpop.f32.mrb[17].mxu0 }
 0x3fc   :  { %v1261_v54 = vadd.f32 %v1492_v51, %v1175_v20 }
 0x3fd   :  { %v1281_v7 = vsel %vm1279_vm0, %v1262_v14, -inf }
 0x3fe   :  { %1298 = vmax.xlane.f32.xlu1 %v1281_v7  ;;  %v2002_v8 = vpop.f32.mrb[18].mxu0  ;;  %v1280_v24 = vsel %vm1279_vm0, %v1261_v54, -inf }
 0x3ff   :  { %v1264_v32 = vadd.f32 %v2002_v8, %v1492_v51  ;;  %1296 = vmax.xlane.f32.xlu0 %v1280_v24  ;;  %v1185_v9 = vpop.f32.mrb[19].mxu0 }
 0x400   :  { %v1263_v27 = vadd.f32 %v1492_v51, %v1185_v9 }
 0x401   :  { %v1283_v23 = vsel %vm1279_vm0, %v1264_v32, -inf }
 0x402   :  { %v2005_v41 = vpop.f32.mrb[20].mxu0  ;;  %v1282_v59 = vsel %vm1279_vm0, %v1263_v27, -inf }
 0x403   :  { %1302 = vmax.xlane.f32.xlu0 %v1283_v23  ;;  %v1195_v49 = vpop.f32.mrb[21].mxu0  ;;  %v1266_v38 = vadd.f32 %v2005_v41, %v1492_v51 }
 0x404   :  { %v1265_v50 = vadd.f32 %v1492_v51, %v1195_v49 }
 0x405   :  { %v1285_v52 = vsel %vm1279_vm0, %v1266_v38, -inf }
 0x406   :  { %v2008_v2 = vpop.f32.mrb[22].mxu0  ;;  %v1284_v0 = vsel %vm1279_vm0, %v1265_v50, -inf }
 0x407   :  { %1300 = vmax.xlane.f32.xlu0 %v1282_v59  ;;  %1304 = vmax.xlane.f32.xlu1 %v1284_v0  ;;  %v1205_v62 = vpop.f32.mrb[23].mxu0  ;;  %v1268_v48 = vadd.f32 %v2008_v2, %v1492_v51 }
 0x408   :  { %v1267_v53 = vadd.f32 %v1492_v51, %v1205_v62 }
 0x409   :  { %v1287_v57 = vsel %vm1279_vm0, %v1268_v48, -inf }
 0x40a   :  { %v2011_v15 = vpop.f32.mrb[24].mxu0  ;;  %v1286_v6 = vsel %vm1279_vm0, %v1267_v53, -inf }
 0x40b   :  { %1306 = vmax.xlane.f32.xlu0 %v1285_v52  ;;  %1308 = vmax.xlane.f32.xlu1 %v1286_v6  ;;  %v1215_v12 = vpop.f32.mrb[25].mxu0  ;;  %v1270_v5 = vadd.f32 %v2011_v15, %v1492_v51 }
 0x40c   :  { %v1269_v63 = vadd.f32 %v1492_v51, %v1215_v12 }
 0x40d   :  { %v3057_v4 = vsel %vm1279_vm0, %v1270_v5, -inf }
 0x40e   :  { %v2014_v55 = vpop.f32.mrb[26].mxu0  ;;  %v1288_v40 = vsel %vm1279_vm0, %v1269_v63, -inf }
 0x40f   :  { %1310 = vmax.xlane.f32.xlu0 %v1287_v57  ;;  %1312 = vmax.xlane.f32.xlu1 %v1288_v40  ;;  %v1225_v11 = vpop.f32.mrb[27].mxu0  ;;  %v1272_v45 = vadd.f32 %v2014_v55, %v1492_v51 }
 0x410   :  { %v1271_v61 = vadd.f32 %v1492_v51, %v1225_v11 }
 0x411   :  { %v3067_v37 = vsel %vm1279_vm0, %v1272_v45, -inf }
 0x412   :  { %v2017_v1 = vpop.f32.mrb[28].mxu0  ;;  %v3061_v3 = vsel %vm1279_vm0, %v1271_v61, -inf }
 0x413   :  { %1314 = vmax.xlane.f32.xlu0 %v3057_v4  ;;  %1316 = vmax.xlane.f32.xlu1 %v3061_v3  ;;  %v1235_v36 = vpop.f32.mrb[29].mxu0  ;;  %v1274_v17 = vadd.f32 %v2017_v1, %v1492_v51 }
 0x414   :  { %v1273_v56 = vadd.f32 %v1492_v51, %v1235_v36 }
 0x415   :  { %v3077_v42 = vsel %vm1279_vm0, %v1274_v17, -inf }
 0x416   :  { %v2020_v13 = vpop.f32.mrb[30].mxu0  ;;  %v3071_v16 = vsel %vm1279_vm0, %v1273_v56, -inf }
 0x417   :  { %1318 = vmax.xlane.f32.xlu0 %v3067_v37  ;;  %1320 = vmax.xlane.f32.xlu1 %v3071_v16  ;;  %v1245_v21 = vpop.f32.mrb[31].mxu0  ;;  %v1276_v22 = vadd.f32 %v2020_v13, %v1492_v51 }
 0x418   :  { %v1275_v26 = vadd.f32 %v1492_v51, %v1245_v21 }
 0x419   :  { %v3087_v30 = vsel %vm1279_vm0, %v1276_v22, -inf }
 0x41a   :  { %v3081_v25 = vsel %vm1279_vm0, %v1275_v26, -inf }
 0x41b   :  { %1322 = vmax.xlane.f32.xlu0 %v3077_v42  ;;  %1324 = vmax.xlane.f32.xlu1 %v3081_v25 }
 0x41f   :  { %1326 = vmax.xlane.f32.xlu0 %v3087_v30 }
 0x48b   :  { %v1299_v28 = vpop.xlane.xlu1 %1298 }
 0x48c   :  { %v3090_v34 = vsub.f32 %v1281_v7, %v1299_v28  ;;  %v1297_v19 = vpop.xlane.xlu0 %1296 }
 0x48d   :  { %v3092_v31 = vsub.f32 %v1280_v24, %v1297_v19 }
 0x48e   :  { %v1346_v35 = vmul.f32 1.442695, %v3090_v34 }
 0x48f   :  { %v1344_v39 = vmul.f32 1.442695, %v3092_v31 }
 0x490   :  { %2256 = vpow2.f32 %v1346_v35  ;;  %v1303_v29 = vpop.xlane.xlu0 %1302 }
 0x491   :  { %2258 = vpow2.f32 %v1344_v39  ;;  %v3096_v33 = vsub.f32 %v1283_v23, %v1303_v29 }
 0x493   :  { %v1350_v43 = vmul.f32 1.442695, %v3096_v33 }
 0x494   :  { %v1301_v18 = vpop.xlane.xlu0 %1300  ;;  %v1305_v44 = vpop.xlane.xlu1 %1304 }
 0x495   :  { %2260 = vpow2.f32 %v1350_v43  ;;  %v3099_v47 = vsub.f32 %v1282_v59, %v1301_v18  ;;  %v3101_v46 = vsub.f32 %v1284_v0, %v1305_v44 }
 0x497   :  { %v1348_v58 = vmul.f32 1.442695, %v3099_v47  ;;  %v1352_v60 = vmul.f32 1.442695, %v3101_v46 }
 0x498   :  { %v1307_v51 = vpop.xlane.xlu0 %1306  ;;  %v1309_v10 = vpop.xlane.xlu1 %1308 }
 0x499   :  { %2262 = vpow2.f32 %v1348_v58  ;;  %v3105_v14 = vsub.f32 %v1285_v52, %v1307_v51  ;;  %v3107_v20 = vsub.f32 %v1286_v6, %v1309_v10 }
 0x49a   :  { %v2257_v54 = vpop.eup %2256  ;;  %2264 = vpow2.f32 %v1352_v60 }
 0x49b   :  { %v2259_v7 = vpop.eup %2258  ;;  %v1354_v8 = vmul.f32 1.442695, %v3105_v14  ;;  %1378 = vadd.xlane.f32.xlu0 %v2257_v54  ;;  %v1356_v24 = vmul.f32 1.442695, %v3107_v20 }
 0x49c   :  { %v1311_v32 = vpop.xlane.xlu0 %1310  ;;  %v1313_v9 = vpop.xlane.xlu1 %1312  ;;  %1376 = vadd.xlane.f32.xlu1 %v2259_v7 }
 0x49d   :  { %2266 = vpow2.f32 %v1354_v8  ;;  %v3111_v23 = vsub.f32 %v1287_v57, %v1311_v32  ;;  %v3113_v27 = vsub.f32 %v1288_v40, %v1313_v9 }
 0x49e   :  { %2268 = vpow2.f32 %v1356_v24 }
 0x49f   :  { %v2261_v41 = vpop.eup %2260  ;;  %v1358_v49 = vmul.f32 1.442695, %v3111_v23  ;;  %v1360_v50 = vmul.f32 1.442695, %v3113_v27 }
 0x4a0   :  { %v1315_v38 = vpop.xlane.xlu0 %1314  ;;  %v1317_v2 = vpop.xlane.xlu1 %1316  ;;  %1382 = vadd.xlane.f32.xlu0 %v2261_v41 }
 0x4a1   :  { %2270 = vpow2.f32 %v1358_v49  ;;  %v3118_v59 = vsub.f32 %v3057_v4, %v1315_v38  ;;  %v3121_v0 = vsub.f32 %v3061_v3, %v1317_v2 }
 0x4a2   :  { %2272 = vpow2.f32 %v1360_v50 }
 0x4a3   :  { %v2263_v62 = vpop.eup %2262  ;;  %v1362_v53 = vmul.f32 1.442695, %v3118_v59  ;;  %v1364_v48 = vmul.f32 1.442695, %v3121_v0 }
 0x4a4   :  { %v1319_v15 = vpop.xlane.xlu0 %1318  ;;  %v1321_v52 = vpop.xlane.xlu1 %1320  ;;  %1380 = vadd.xlane.f32.xlu1 %v2263_v62 }
 0x4a5   :  { %2274 = vpow2.f32 %v1362_v53  ;;  %v3126_v6 = vsub.f32 %v3067_v37, %v1319_v15  ;;  %v3129_v12 = vsub.f32 %v3071_v16, %v1321_v52  ;;  %v2265_v63 = vpop.eup %2264 }
 0x4a6   :  { %2276 = vpow2.f32 %v1364_v48 }
 0x4a7   :  { %v2267_v5 = vpop.eup %2266  ;;  %v1366_v55 = vmul.f32 1.442695, %v3126_v6  ;;  %v1368_v57 = vmul.f32 1.442695, %v3129_v12 }
 0x4a8   :  { %v1323_v40 = vpop.xlane.xlu0 %1322  ;;  %1386 = vadd.xlane.f32.xlu0 %v2267_v5  ;;  %1384 = vadd.xlane.f32.xlu1 %v2265_v63  ;;  %v1325_v11 = vpop.xlane.xlu1 %1324 }
 0x4a9   :  { %2278 = vpow2.f32 %v1366_v55  ;;  %v3134_v61 = vsub.f32 %v3077_v42, %v1323_v40  ;;  %v3137_v45 = vsub.f32 %v3081_v25, %v1325_v11  ;;  %v2269_v1 = vpop.eup %2268 }
 0x4aa   :  { %2280 = vpow2.f32 %v1368_v57 }
 0x4ab   :  { %v2271_v4 = vpop.eup %2270  ;;  %v1370_v3 = vmul.f32 1.442695, %v3134_v61  ;;  %v1372_v36 = vmul.f32 1.442695, %v3137_v45 }
 0x4ac   :  { %1390 = vadd.xlane.f32.xlu0 %v2271_v4  ;;  %v1327_v56 = vpop.xlane.xlu0 %1326  ;;  %1388 = vadd.xlane.f32.xlu1 %v2269_v1  ;;  %v2273_v13 = vpop.eup %2272 }
 0x4ad   :  { %2282 = vpow2.f32 %v1370_v3  ;;  %v3142_v17 = vsub.f32 %v3087_v30, %v1327_v56 }
 0x4ae   :  { %2284 = vpow2.f32 %v1372_v36 }
 0x4af   :  { %v2275_v37 = vpop.eup %2274  ;;  %v1374_v16 = vmul.f32 1.442695, %v3142_v17 }
 0x4b0   :  { %1394 = vadd.xlane.f32.xlu0 %v2275_v37  ;;  %1392 = vadd.xlane.f32.xlu1 %v2273_v13  ;;  %v2277_v21 = vpop.eup %2276 }
 0x4b1   :  { %2286 = vpow2.f32 %v1374_v16 }
 0x4b3   :  { %v2279_v26 = vpop.eup %2278 }
 0x4b4   :  { %1398 = vadd.xlane.f32.xlu0 %v2279_v26  ;;  %1396 = vadd.xlane.f32.xlu1 %v2277_v21  ;;  %v2281_v22 = vpop.eup %2280 }
 0x4b7   :  { %v2283_v42 = vpop.eup %2282 }
 0x4b8   :  { %1402 = vadd.xlane.f32.xlu0 %v2283_v42  ;;  %1400 = vadd.xlane.f32.xlu1 %v2281_v22  ;;  %v2285_v25 = vpop.eup %2284 }
 0x4bb   :  { %v2287_v28 = vpop.eup %2286 }
 0x4bc   :  { %1406 = vadd.xlane.f32.xlu0 %v2287_v28  ;;  %1404 = vadd.xlane.f32.xlu1 %v2285_v25 }
 0x528   :  { %v1379_v30 = vpop.xlane.xlu0 %1378 }
 0x529   :  { %2288 = vlog2.f32 %v1379_v30  ;;  %v1377_v19 = vpop.xlane.xlu1 %1376 }
 0x52a   :  { %2290 = vlog2.f32 %v1377_v19 }
 0x52d   :  { %v1383_v35 = vpop.xlane.xlu0 %1382 }
 0x52e   :  { %2292 = vlog2.f32 %v1383_v35 }
 0x531   :  { %v1381_v39 = vpop.xlane.xlu1 %1380 }
 0x532   :  { %2294 = vlog2.f32 %v1381_v39 }
 0x533   :  { %v2289_v29 = vpop.eup %2288 }
 0x534   :  { %v2291_v43 = vpop.eup %2290  ;;  %v1411_v18 = vmul.f32 0.6931472, %v2289_v29 }
 0x535   :  { %v1409_v44 = vmul.f32 0.6931472, %v2291_v43  ;;  %v1387_v58 = vpop.xlane.xlu0 %1386  ;;  %v1385_v60 = vpop.xlane.xlu1 %1384 }
 0x536   :  { %v1441_v51 = vsub.f32 %v3090_v34, %v1411_v18  ;;  %2296 = vlog2.f32 %v1387_v58 }
 0x537   :  { %v1440_v10 = vsub.f32 %v3092_v31, %v1409_v44  ;;  %2298 = vlog2.f32 %v1385_v60 }
 0x538   :  { %v2293_v54 = vpop.eup %2292  ;;  %1457 = vst [vmem:[#allocation11 + $0x8] sm:$0xff] %v1441_v51 }
 0x539   :  { %1456 = vst [vmem:[#allocation11] sm:$0xff] %v1440_v10  ;;  %v1415_v7 = vmul.f32 0.6931472, %v2293_v54  ;;  %v1391_v8 = vpop.xlane.xlu0 %1390  ;;  %v1389_v24 = vpop.xlane.xlu1 %1388 }
 0x53a   :  { %2300 = vlog2.f32 %v1391_v8 }
 0x53b   :  { %v1443_v32 = vsub.f32 %v3096_v33, %v1415_v7  ;;  %2302 = vlog2.f32 %v1389_v24 }
 0x53c   :  { %v2295_v9 = vpop.eup %2294 }
 0x53d   :  { %1459 = vst [vmem:[#allocation11 + $0x18] sm:$0xff] %v1443_v32  ;;  %v1413_v41 = vmul.f32 0.6931472, %v2295_v9  ;;  %v1395_v49 = vpop.xlane.xlu0 %1394  ;;  %v1393_v50 = vpop.xlane.xlu1 %1392 }
 0x53e   :  { %2304 = vlog2.f32 %v1395_v49 }
 0x53f   :  { %v1442_v34 = vsub.f32 %v3099_v47, %v1413_v41  ;;  %2306 = vlog2.f32 %v1393_v50 }
 0x540   :  { %v2297_v31 = vpop.eup %2296 }
 0x541   :  { %v2299_v38 = vpop.eup %2298  ;;  %1458 = vst [vmem:[#allocation11 + $0x10] sm:$0xff] %v1442_v34  ;;  %v1419_v2 = vmul.f32 0.6931472, %v2297_v31  ;;  %v1399_v62 = vpop.xlane.xlu0 %1398 }
 0x542   :  { %v1397_v53 = vpop.xlane.xlu1 %1396  ;;  %v1417_v48 = vmul.f32 0.6931472, %v2299_v38  ;;  %2308 = vlog2.f32 %v1399_v62 }
 0x543   :  { %v1445_v33 = vsub.f32 %v3105_v14, %v1419_v2  ;;  %2310 = vlog2.f32 %v1397_v53 }
 0x544   :  { %v2301_v15 = vpop.eup %2300  ;;  %v1444_v52 = vsub.f32 %v3101_v46, %v1417_v48 }
 0x545   :  { %v2303_v63 = vpop.eup %2302  ;;  %1461 = vst [vmem:[#allocation11 + $0x28] sm:$0xff] %v1445_v33  ;;  %v1423_v5 = vmul.f32 0.6931472, %v2301_v15  ;;  %v1403_v55 = vpop.xlane.xlu0 %1402 }
 0x546   :  { %v1401_v47 = vpop.xlane.xlu1 %1400  ;;  %1460 = vst [vmem:[#allocation11 + $0x20] sm:$0xff] %v1444_v52  ;;  %v1421_v57 = vmul.f32 0.6931472, %v2303_v63  ;;  %2312 = vlog2.f32 %v1403_v55 }
 0x547   :  { %v1447_v40 = vsub.f32 %v3111_v23, %v1423_v5  ;;  %2314 = vlog2.f32 %v1401_v47 }
 0x548   :  { %v2305_v11 = vpop.eup %2304  ;;  %v1446_v1 = vsub.f32 %v3107_v20, %v1421_v57 }
 0x549   :  { %v2307_v4 = vpop.eup %2306  ;;  %1463 = vst [vmem:[#allocation11 + $0x38] sm:$0xff] %v1447_v40  ;;  %v1427_v14 = vmul.f32 0.6931472, %v2305_v11  ;;  %v1407_v3 = vpop.xlane.xlu0 %1406 }
 0x54a   :  { %v1405_v36 = vpop.xlane.xlu1 %1404  ;;  %1462 = vst [vmem:[#allocation11 + $0x30] sm:$0xff] %v1446_v1  ;;  %v1425_v46 = vmul.f32 0.6931472, %v2307_v4  ;;  %2316 = vlog2.f32 %v1407_v3 }
 0x54b   :  { %v1449_v56 = vsub.f32 %v3118_v59, %v1427_v14  ;;  %2318 = vlog2.f32 %v1405_v36 }
 0x54c   :  { %v2309_v13 = vpop.eup %2308  ;;  %v1448_v37 = vsub.f32 %v3113_v27, %v1425_v46 }
 0x54d   :  { %v2311_v16 = vpop.eup %2310  ;;  %1465 = vst [vmem:[#allocation11 + $0x48] sm:$0xff] %v1449_v56  ;;  %v1431_v23 = vmul.f32 0.6931472, %v2309_v13 }
 0x54e   :  { %1464 = vst [vmem:[#allocation11 + $0x40] sm:$0xff] %v1448_v37  ;;  %v1429_v21 = vmul.f32 0.6931472, %v2311_v16 }
 0x54f   :  { %v1451_v20 = vsub.f32 %v3126_v6, %v1431_v23 }
 0x550   :  { %v2313_v26 = vpop.eup %2312  ;;  %v1450_v22 = vsub.f32 %v3121_v0, %v1429_v21 }
 0x551   :  { %v2315_v42 = vpop.eup %2314  ;;  %1467 = vst [vmem:[#allocation11 + $0x58] sm:$0xff] %v1451_v20  ;;  %v1435_v25 = vmul.f32 0.6931472, %v2313_v26 }
 0x552   :  { %1466 = vst [vmem:[#allocation11 + $0x50] sm:$0xff] %v1450_v22  ;;  %v1433_v28 = vmul.f32 0.6931472, %v2315_v42 }
 0x553   :  { %v1453_v59 = vsub.f32 %v3134_v61, %v1435_v25 }
 0x554   :  { %v2317_v30 = vpop.eup %2316  ;;  %v1452_v27 = vsub.f32 %v3129_v12, %v1433_v28 }
 0x555   :  { %v2319_v19 = vpop.eup %2318  ;;  %1469 = vst [vmem:[#allocation11 + $0x68] sm:$0xff] %v1453_v59  ;;  %v1439_v35 = vmul.f32 0.6931472, %v2317_v30 }
 0x556   :  { %1468 = vst [vmem:[#allocation11 + $0x60] sm:$0xff] %v1452_v27  ;;  %v1437_v6 = vmul.f32 0.6931472, %v2319_v19 }
 0x557   :  { %v1455_v39 = vsub.f32 %v3142_v17, %v1439_v35 }
 0x558   :  { %v1454_v0 = vsub.f32 %v3137_v45, %v1437_v6 }
 0x559   :  { %1471 = vst [vmem:[#allocation11 + $0x78] sm:$0xff] %v1455_v39 }
 0x55a   :  { %1470 = vst [vmem:[#allocation11 + $0x70] sm:$0xff] %v1454_v0 }
 0x55b   :  { %2441 = shalt.err (!%p2438_p2)
}
 0x55c   :  { %s2442_s12 = scalar_lea.hbm %s3185_s9, 2048 }
 0x55d   :  { %p2443_p3 = scmp.ne.s32.totalorder %s3185_s9, %s2442_s12  ;;  %p2446_p4 = scmp.lt.u32.totalorder %s2442_s12, %s3185_s9 }
 0x55f   :  { %p2448_p5 = pnand %p2446_p4, %p2443_p3 }
 0x561   :  { %2451 = shalt.err (!%p2448_p5)
}
 0x562   :  { %1483 = dma.vmem_to_hbm [thread:$0]  %s1478_s24, 2048, %s3185_s9, [#allocation4], %s2462_s21, %s2462_s21, %s2463_s22  }
 0x563   :  { %2458 = dma.done.wait [#allocation4], 2048  }
 0x564   :  { %2459 = vsyncadd [#allocation4], 4294965248 }
 0x565   :  { %1487 = vsyncpa [#allocation3], 1 }
 0x566   :  { %1488 = vsyncpa [#allocation6], 1 }
 0x567   :  { %1489 = vsyncpa [#allocation9], 1 }
 0x568   :  { %1490 = vsyncpa [#allocation4], 1 }

</bundles_post_ra>
